<compile_context>
chip_gen: v6e
topology: v6e:2x2x1
jax: 0.10.0
libtpu: 0.0.40
codegen_flags: <defaults>
</compile_context>

<pallas_src>
import functools

import numpy as np
import jax
import jax.numpy as jnp
from jax import lax
from jax.experimental import pallas as pl
from jax.experimental.pallas import tpu as pltpu


# ----------------------------- fused Pallas kernel -----------------------------

def _make_maml_task_kernel(update_lr, update_step, n_spt, n_qry, nclass):
    """Build the per-task fused MAML inner-loop kernel (one grid step = one task)."""
    inv_ns = 1.0 / float(n_spt)
    inv_nq = 1.0 / float(n_qry)
    lr = float(update_lr)

    def kernel(xs_ref, ys1h_ref, xq_ref, yq1h_ref, yq_ref,
               w1_ref, b1_ref, w2_ref, b2_ref,
               lossq_ref, correct_ref):
        xs = xs_ref[...]        # (n_spt, F)  f32
        ys = ys1h_ref[...]      # (n_spt, C)  f32 one-hot
        xq = xq_ref[...]        # (n_qry, F)  f32
        yq1h = yq1h_ref[...]    # (n_qry, C)  f32 one-hot
        yq = yq_ref[...]        # (n_qry, 1)  int32 labels

        def grad_step(w1, b1, w2, b2):
            """One support-set fwd + analytic CE backward + fused SGD update."""
            h_pre = jnp.dot(xs, w1, preferred_element_type=jnp.float32) + b1
            h = jnp.maximum(h_pre, 0.0)
            logits = jnp.dot(h, w2, preferred_element_type=jnp.float32) + b2

            # softmax (stable); no loss value is computed — it was unused.
            m = jnp.max(logits, axis=-1, keepdims=True)
            e = jnp.exp(logits - m)
            p = e / jnp.sum(e, axis=-1, keepdims=True)

            dlogits = (p - ys) * inv_ns                       # (n_spt, C)

            # dW2 = h^T @ dlogits  (contract batch dim)
            dw2 = lax.dot_general(h, dlogits, (((0,), (0,)), ((), ())),
                                  preferred_element_type=jnp.float32)
            db2 = jnp.sum(dlogits, axis=0, keepdims=True)

            # dh = dlogits @ W2^T, masked by relu
            dh = lax.dot_general(dlogits, w2, (((1,), (1,)), ((), ())),
                                 preferred_element_type=jnp.float32)
            dh = jnp.where(h_pre > 0.0, dh, 0.0)

            dw1 = lax.dot_general(xs, dh, (((0,), (0,)), ((), ())),
                                  preferred_element_type=jnp.float32)
            db1 = jnp.sum(dh, axis=0, keepdims=True)

            # fused inner SGD update (fast weights stay in registers)
            return (w1 - lr * dw1, b1 - lr * db1,
                    w2 - lr * dw2, b2 - lr * db2)

        # first inner update from the meta parameters (matches reference)
        fast = grad_step(w1_ref[...], b1_ref[...], w2_ref[...], b2_ref[...])

        loss_vec = jnp.zeros((1, update_step), jnp.float32)
        corr_vec = jnp.zeros((1, update_step), jnp.int32)
        step_iota = lax.broadcasted_iota(jnp.int32, (1, update_step), 1)

        # update_step is small and static — fully unroll for the LLO scheduler.
        for k in range(update_step):
            fast = grad_step(*fast)
            w1f, b1f, w2f, b2f = fast

            # query-set forward + CE loss + argmax-correct count
            hq = jnp.maximum(
                jnp.dot(xq, w1f, preferred_element_type=jnp.float32) + b1f, 0.0)
            lq = jnp.dot(hq, w2f, preferred_element_type=jnp.float32) + b2f

            mq = jnp.max(lq, axis=-1, keepdims=True)
            eq = jnp.exp(lq - mq)
            sq = jnp.sum(eq, axis=-1, keepdims=True)
            logp = lq - mq - jnp.log(sq)
            loss_k = -jnp.sum(yq1h * logp) * inv_nq

            # first-max argmax (matches torch argmax tie-breaking) via iota + min
            col = lax.broadcasted_iota(jnp.int32, lq.shape, 1)
            pred = jnp.min(jnp.where(lq == mq, col, nclass), axis=-1,
                           keepdims=True)                       # (n_qry, 1)
            corr_k = jnp.sum((pred == yq).astype(jnp.int32))

            loss_vec = jnp.where(step_iota == k, loss_k, loss_vec)
            corr_vec = jnp.where(step_iota == k, corr_k, corr_vec)

        lossq_ref[...] = loss_vec
        correct_ref[...] = corr_vec

    return kernel


# ----------------------------- Pallas wrapper -----------------------------

@functools.lru_cache(maxsize=None)
def _build_meta_forward_fn(task_num, n_spt, n_qry, nfeat, hidden, nclass,
                           update_lr, update_step):
    kernel = _make_maml_task_kernel(update_lr, update_step, n_spt, n_qry, nclass)

    fused = pl.pallas_call(
        kernel,
        out_shape=(
            jax.ShapeDtypeStruct((task_num, 1, update_step), jnp.float32),
            jax.ShapeDtypeStruct((task_num, 1, update_step), jnp.int32),
        ),
        grid=(task_num,),
        in_specs=[
            pl.BlockSpec((None, n_spt, nfeat), lambda t: (t, 0, 0)),   # x_spt[t]
            pl.BlockSpec((None, n_spt, nclass), lambda t: (t, 0, 0)),  # y_spt 1-hot
            pl.BlockSpec((None, n_qry, nfeat), lambda t: (t, 0, 0)),   # x_qry[t]
            pl.BlockSpec((None, n_qry, nclass), lambda t: (t, 0, 0)),  # y_qry 1-hot
            pl.BlockSpec((None, n_qry, 1), lambda t: (t, 0, 0)),       # y_qry labels
            pl.BlockSpec((nfeat, hidden), lambda t: (0, 0)),           # W1 (shared)
            pl.BlockSpec((1, hidden), lambda t: (0, 0)),               # b1
            pl.BlockSpec((hidden, nclass), lambda t: (0, 0)),          # W2
            pl.BlockSpec((1, nclass), lambda t: (0, 0)),               # b2
        ],
        out_specs=(
            pl.BlockSpec((None, 1, update_step), lambda t: (t, 0, 0)),  # losses
            pl.BlockSpec((None, 1, update_step), lambda t: (t, 0, 0)),  # corrects
        ),
        compiler_params=pltpu.CompilerParams(
            dimension_semantics=("parallel",)),   # tasks shard across TCs on v7x
    )

    @jax.jit
    def run(x_spt, y_spt, x_qry, y_qry, w1, b1, w2, b2, eff_w):
        y1h_s = jax.nn.one_hot(y_spt, nclass, dtype=jnp.float32)
        y1h_q = jax.nn.one_hot(y_qry, nclass, dtype=jnp.float32)
        yq_col = y_qry.astype(jnp.int32)[..., None]
        loss_steps, corr_steps = fused(x_spt, y1h_s, x_qry, y1h_q, yq_col,
                                       w1, b1, w2, b2)
        loss_steps = loss_steps[:, 0, :]          # (task_num, update_step)
        corr_steps = corr_steps[:, 0, :]          # (task_num, update_step)
        mean_loss = jnp.sum(loss_steps * eff_w[None, :]) / task_num
        corrects = jnp.sum(corr_steps, axis=0)    # (update_step,) int32
        return mean_loss, corrects

    return run


# ----------------------------- Meta forward -----------------------------

def per_step_loss_importance(epoch, n_steps, msl_epochs):
    lw = np.ones(n_steps) * (1.0 / n_steps)
    decay_rate = 1.0 / n_steps / msl_epochs
    min_val = 0.03 / n_steps
    for i in range(len(lw) - 1):
        lw[i] = np.maximum(lw[i] - epoch * decay_rate, min_val)
    lw[-1] = np.minimum(lw[-1] + epoch * (n_steps - 1) * decay_rate,
                        1.0 - (n_steps - 1) * min_val)
    return lw


def meta_forward(epoch, x_spt, y_spt, x_qry, y_qry, params, *,
                 update_lr, update_step, n_steps_per_iter, msl_epochs, nclass):
    """Mirrors Meta.forward: returns (mean task loss, per-step accuracies)."""
    w1, b1, w2, b2 = params
    task_num, n_spt, nfeat = x_spt.shape
    n_qry = x_qry.shape[1]
    hidden = w1.shape[1]

    run = _build_meta_forward_fn(task_num, n_spt, n_qry, nfeat, hidden, nclass,
                                 float(update_lr), int(update_step))

    # Effective per-step weighting of the query losses (MSL mechanism).
    lw = per_step_loss_importance(epoch, n_steps_per_iter, msl_epochs)
    if epoch < msl_epochs:
        eff = np.array([lw[k] if k < len(lw) else 0.0 for k in range(update_step)],
                       dtype=np.float32)
    else:
        eff = np.array([1.0 if k == n_steps_per_iter - 1 else 0.0
                        for k in range(update_step)], dtype=np.float32)

    mean_loss, corrects = run(x_spt, y_spt, x_qry, y_qry, w1, b1, w2, b2,
                              jnp.asarray(eff))

    # Single device->host transfer for the whole forward pass.
    mean_loss, corrects = jax.device_get(
        jax.block_until_ready((mean_loss, corrects)))
    accs = np.asarray(corrects, dtype=np.float64) / (n_qry * task_num)

    # TODO(synk): the outer Adam meta-update side effect (losses.backward();
    # meta_optim.step()) is not implemented — (loss, accs) do not depend on it.
    return float(mean_loss), accs


# ----------------------------- main -----------------------------

if __name__ == "__main__":
    TASK_NUM, N_SPT, N_QRY = 2, 8, 8
    NFEAT, HIDDEN, NCLASS = 32, 32, 8
    UPDATE_LR = 0.1
    UPDATE_STEP = 3
    N_STEPS_PER_ITER = 3
    MSL_EPOCHS = 10
    EPOCH = 2

    key = jax.random.PRNGKey(0)
    k = jax.random.split(key, 6)

    x_spt = jax.random.normal(k[0], (TASK_NUM, N_SPT, NFEAT), dtype=jnp.float32)
    y_spt = jax.random.randint(k[1], (TASK_NUM, N_SPT), 0, NCLASS, dtype=jnp.int32)
    x_qry = jax.random.normal(k[2], (TASK_NUM, N_QRY, NFEAT), dtype=jnp.float32)
    y_qry = jax.random.randint(k[3], (TASK_NUM, N_QRY), 0, NCLASS, dtype=jnp.int32)

    # deterministic parameter init for the base MLP learner
    w1 = 0.1 * jax.random.normal(k[4], (NFEAT, HIDDEN), dtype=jnp.float32)
    b1 = jnp.zeros((1, HIDDEN), dtype=jnp.float32)
    w2 = 0.1 * jax.random.normal(k[5], (HIDDEN, NCLASS), dtype=jnp.float32)
    b2 = jnp.zeros((1, NCLASS), dtype=jnp.float32)

    loss, accs = meta_forward(
        EPOCH, x_spt, y_spt, x_qry, y_qry, (w1, b1, w2, b2),
        update_lr=UPDATE_LR, update_step=UPDATE_STEP,
        n_steps_per_iter=N_STEPS_PER_ITER, msl_epochs=MSL_EPOCHS,
        nclass=NCLASS)

    assert np.isfinite(loss)
    assert accs.shape == (UPDATE_STEP,)
    assert np.all((accs >= 0.0) & (accs <= 1.0))
    print("KERNEL_OK")
</pallas_src>

<mosaic_0001>
module attributes {stable_mosaic.version = 11 : i64} {
  func.func @kernel(%arg0: i32, %arg1: memref<1x8x32xf32, #tpu.memory_space<vmem>>, %arg2: memref<1x8x8xf32, #tpu.memory_space<vmem>>, %arg3: memref<1x8x32xf32, #tpu.memory_space<vmem>>, %arg4: memref<1x8x8xf32, #tpu.memory_space<vmem>>, %arg5: memref<1x8x1xi32, #tpu.memory_space<vmem>>, %arg6: memref<32x32xf32, #tpu.memory_space<vmem>>, %arg7: memref<1x32xf32, #tpu.memory_space<vmem>>, %arg8: memref<32x8xf32, #tpu.memory_space<vmem>>, %arg9: memref<1x8xf32, #tpu.memory_space<vmem>>, %arg10: memref<1x1x3xf32, #tpu.memory_space<vmem>>, %arg11: memref<1x1x3xi32, #tpu.memory_space<vmem>>) attributes {dimension_semantics = [#tpu.dimension_semantics<parallel>], iteration_bounds = array<i64: 2>, scalar_prefetch = 0 : i64, scratch_operands = 0 : i64, tpu.core_type = #tpu.core_type<tc>, window_params = [{transform_indices = @transform_0, window_bounds = array<i64: 1, 8, 32>}, {transform_indices = @transform_1, window_bounds = array<i64: 1, 8, 8>}, {transform_indices = @transform_2, window_bounds = array<i64: 1, 8, 32>}, {transform_indices = @transform_3, window_bounds = array<i64: 1, 8, 8>}, {transform_indices = @transform_4, window_bounds = array<i64: 1, 8, 1>}, {pipeline_mode = #tpu.pipeline_mode<synchronous>, transform_indices = @transform_5, window_bounds = array<i64: 32, 32>}, {pipeline_mode = #tpu.pipeline_mode<synchronous>, transform_indices = @transform_6, window_bounds = array<i64: 1, 32>}, {pipeline_mode = #tpu.pipeline_mode<synchronous>, transform_indices = @transform_7, window_bounds = array<i64: 32, 8>}, {pipeline_mode = #tpu.pipeline_mode<synchronous>, transform_indices = @transform_8, window_bounds = array<i64: 1, 8>}, {transform_indices = @transform_9, window_bounds = array<i64: 1, 1, 3>}, {transform_indices = @transform_10, window_bounds = array<i64: 1, 1, 3>}]} {
    %c0 = arith.constant 0 : index
    %c0_0 = arith.constant 0 : index
    %c0_1 = arith.constant 0 : index
    %0 = vector.load %arg1[%c0, %c0_0, %c0_1] : memref<1x8x32xf32, #tpu.memory_space<vmem>>, vector<1x8x32xf32>
    %1 = vector.shape_cast %0 : vector<1x8x32xf32> to vector<8x32xf32>
    %c0_2 = arith.constant 0 : index
    %c0_3 = arith.constant 0 : index
    %c0_4 = arith.constant 0 : index
    %2 = vector.load %arg2[%c0_2, %c0_3, %c0_4] : memref<1x8x8xf32, #tpu.memory_space<vmem>>, vector<1x8x8xf32>
    %3 = vector.shape_cast %2 : vector<1x8x8xf32> to vector<8x8xf32>
    %c0_5 = arith.constant 0 : index
    %c0_6 = arith.constant 0 : index
    %c0_7 = arith.constant 0 : index
    %4 = vector.load %arg3[%c0_5, %c0_6, %c0_7] : memref<1x8x32xf32, #tpu.memory_space<vmem>>, vector<1x8x32xf32>
    %5 = vector.shape_cast %4 : vector<1x8x32xf32> to vector<8x32xf32>
    %c0_8 = arith.constant 0 : index
    %c0_9 = arith.constant 0 : index
    %c0_10 = arith.constant 0 : index
    %6 = vector.load %arg4[%c0_8, %c0_9, %c0_10] : memref<1x8x8xf32, #tpu.memory_space<vmem>>, vector<1x8x8xf32>
    %7 = vector.shape_cast %6 : vector<1x8x8xf32> to vector<8x8xf32>
    %c0_11 = arith.constant 0 : index
    %c0_12 = arith.constant 0 : index
    %c0_13 = arith.constant 0 : index
    %8 = vector.load %arg5[%c0_11, %c0_12, %c0_13] : memref<1x8x1xi32, #tpu.memory_space<vmem>>, vector<1x8x1xi32>
    %9 = vector.shape_cast %8 : vector<1x8x1xi32> to vector<8x1xi32>
    %c0_14 = arith.constant 0 : index
    %c0_15 = arith.constant 0 : index
    %10 = vector.load %arg6[%c0_14, %c0_15] : memref<32x32xf32, #tpu.memory_space<vmem>>, vector<32x32xf32>
    %c0_16 = arith.constant 0 : index
    %c0_17 = arith.constant 0 : index
    %11 = vector.load %arg7[%c0_16, %c0_17] : memref<1x32xf32, #tpu.memory_space<vmem>>, vector<1x32xf32>
    %c0_18 = arith.constant 0 : index
    %c0_19 = arith.constant 0 : index
    %12 = vector.load %arg8[%c0_18, %c0_19] : memref<32x8xf32, #tpu.memory_space<vmem>>, vector<32x8xf32>
    %c0_20 = arith.constant 0 : index
    %c0_21 = arith.constant 0 : index
    %13 = vector.load %arg9[%c0_20, %c0_21] : memref<1x8xf32, #tpu.memory_space<vmem>>, vector<1x8xf32>
    %cst = arith.constant dense<0.000000e+00> : vector<8x32xf32>
    %14 = tpu.matmul %1, %10, %cst {dimension_numbers = #tpu.dot_dimension_numbers<[1], [0], [0], [1], [0, 0, 1, 1], [], []>} : vector<8x32xf32>, vector<32x32xf32>, vector<8x32xf32> -> vector<8x32xf32>
    %15 = vector.broadcast %11 : vector<1x32xf32> to vector<8x32xf32>
    %16 = arith.addf %14, %15 : vector<8x32xf32>
    %cst_22 = arith.constant 0.000000e+00 : f32
    %17 = vector.broadcast %cst_22 : f32 to vector<8x32xf32>
    %18 = arith.maximumf %16, %17 : vector<8x32xf32>
    %cst_23 = arith.constant dense<0.000000e+00> : vector<8x8xf32>
    %19 = tpu.matmul %18, %12, %cst_23 {dimension_numbers = #tpu.dot_dimension_numbers<[1], [0], [0], [1], [0, 0, 1, 1], [], []>} : vector<8x32xf32>, vector<32x8xf32>, vector<8x8xf32> -> vector<8x8xf32>
    %20 = vector.broadcast %13 : vector<1x8xf32> to vector<8x8xf32>
    %21 = arith.addf %19, %20 : vector<8x8xf32>
    %cst_24 = arith.constant dense<0xFF800000> : vector<8xf32>
    %22 = vector.multi_reduction <maximumf>, %21, %cst_24 [1] : vector<8x8xf32> to vector<8xf32>
    %23 = vector.shape_cast %22 : vector<8xf32> to vector<8x1xf32>
    %24 = vector.broadcast %23 : vector<8x1xf32> to vector<8x8xf32>
    %25 = arith.subf %21, %24 : vector<8x8xf32>
    %26 = math.exp %25 : vector<8x8xf32>
    %cst_25 = arith.constant dense<0.000000e+00> : vector<8xf32>
    %27 = vector.multi_reduction <add>, %26, %cst_25 [1] : vector<8x8xf32> to vector<8xf32>
    %28 = vector.shape_cast %27 : vector<8xf32> to vector<8x1xf32>
    %29 = vector.broadcast %28 : vector<8x1xf32> to vector<8x8xf32>
    %30 = arith.divf %26, %29 : vector<8x8xf32>
    %31 = arith.subf %30, %3 : vector<8x8xf32>
    %cst_26 = arith.constant 1.250000e-01 : f32
    %32 = vector.broadcast %cst_26 : f32 to vector<8x8xf32>
    %33 = arith.mulf %31, %32 : vector<8x8xf32>
    %cst_27 = arith.constant dense<0.000000e+00> : vector<32x8xf32>
    %34 = tpu.matmul %18, %33, %cst_27 {dimension_numbers = #tpu.dot_dimension_numbers<[0], [0], [1], [1], [0, 1, 1, 1], [], []>} : vector<8x32xf32>, vector<8x8xf32>, vector<32x8xf32> -> vector<32x8xf32>
    %cst_28 = arith.constant dense<0.000000e+00> : vector<8xf32>
    %35 = vector.multi_reduction <add>, %33, %cst_28 [0] : vector<8x8xf32> to vector<8xf32>
    %36 = vector.shape_cast %35 : vector<8xf32> to vector<1x8xf32>
    %cst_29 = arith.constant dense<0.000000e+00> : vector<8x32xf32>
    %37 = tpu.matmul %33, %12, %cst_29 {dimension_numbers = #tpu.dot_dimension_numbers<[1], [1], [0], [0], [0, 0, 1, 0], [], []>} : vector<8x8xf32>, vector<32x8xf32>, vector<8x32xf32> -> vector<8x32xf32>
    %cst_30 = arith.constant 0.000000e+00 : f32
    %38 = vector.broadcast %cst_30 : f32 to vector<8x32xf32>
    %39 = arith.cmpf ogt, %16, %38 : vector<8x32xf32>
    %cst_31 = arith.constant 0.000000e+00 : f32
    %40 = vector.broadcast %cst_31 : f32 to vector<8x32xf32>
    %41 = arith.select %39, %37, %40 : vector<8x32xi1>, vector<8x32xf32>
    %cst_32 = arith.constant dense<0.000000e+00> : vector<32x32xf32>
    %42 = tpu.matmul %1, %41, %cst_32 {dimension_numbers = #tpu.dot_dimension_numbers<[0], [0], [1], [1], [0, 1, 1, 1], [], []>} : vector<8x32xf32>, vector<8x32xf32>, vector<32x32xf32> -> vector<32x32xf32>
    %cst_33 = arith.constant dense<0.000000e+00> : vector<32xf32>
    %43 = vector.multi_reduction <add>, %41, %cst_33 [0] : vector<8x32xf32> to vector<32xf32>
    %44 = vector.shape_cast %43 : vector<32xf32> to vector<1x32xf32>
    %cst_34 = arith.constant 1.000000e-01 : f32
    %45 = vector.broadcast %cst_34 : f32 to vector<32x32xf32>
    %46 = arith.mulf %45, %42 : vector<32x32xf32>
    %47 = arith.subf %10, %46 : vector<32x32xf32>
    %cst_35 = arith.constant 1.000000e-01 : f32
    %48 = vector.broadcast %cst_35 : f32 to vector<1x32xf32>
    %49 = arith.mulf %48, %44 : vector<1x32xf32>
    %50 = arith.subf %11, %49 : vector<1x32xf32>
    %cst_36 = arith.constant 1.000000e-01 : f32
    %51 = vector.broadcast %cst_36 : f32 to vector<32x8xf32>
    %52 = arith.mulf %51, %34 : vector<32x8xf32>
    %53 = arith.subf %12, %52 : vector<32x8xf32>
    %cst_37 = arith.constant 1.000000e-01 : f32
    %54 = vector.broadcast %cst_37 : f32 to vector<1x8xf32>
    %55 = arith.mulf %54, %36 : vector<1x8xf32>
    %56 = arith.subf %13, %55 : vector<1x8xf32>
    %cst_38 = arith.constant 0.000000e+00 : f32
    %57 = vector.broadcast %cst_38 : f32 to vector<1x3xf32>
    %c0_i32 = arith.constant 0 : i32
    %58 = vector.broadcast %c0_i32 : i32 to vector<1x3xi32>
    %59 = tpu.iota {dimensions = array<i32: 1>} : vector<1x3xi32>
    %cst_39 = arith.constant dense<0.000000e+00> : vector<8x32xf32>
    %60 = tpu.matmul %1, %47, %cst_39 {dimension_numbers = #tpu.dot_dimension_numbers<[1], [0], [0], [1], [0, 0, 1, 1], [], []>} : vector<8x32xf32>, vector<32x32xf32>, vector<8x32xf32> -> vector<8x32xf32>
    %61 = vector.broadcast %50 : vector<1x32xf32> to vector<8x32xf32>
    %62 = arith.addf %60, %61 : vector<8x32xf32>
    %cst_40 = arith.constant 0.000000e+00 : f32
    %63 = vector.broadcast %cst_40 : f32 to vector<8x32xf32>
    %64 = arith.maximumf %62, %63 : vector<8x32xf32>
    %cst_41 = arith.constant dense<0.000000e+00> : vector<8x8xf32>
    %65 = tpu.matmul %64, %53, %cst_41 {dimension_numbers = #tpu.dot_dimension_numbers<[1], [0], [0], [1], [0, 0, 1, 1], [], []>} : vector<8x32xf32>, vector<32x8xf32>, vector<8x8xf32> -> vector<8x8xf32>
    %66 = vector.broadcast %56 : vector<1x8xf32> to vector<8x8xf32>
    %67 = arith.addf %65, %66 : vector<8x8xf32>
    %cst_42 = arith.constant dense<0xFF800000> : vector<8xf32>
    %68 = vector.multi_reduction <maximumf>, %67, %cst_42 [1] : vector<8x8xf32> to vector<8xf32>
    %69 = vector.shape_cast %68 : vector<8xf32> to vector<8x1xf32>
    %70 = vector.broadcast %69 : vector<8x1xf32> to vector<8x8xf32>
    %71 = arith.subf %67, %70 : vector<8x8xf32>
    %72 = math.exp %71 : vector<8x8xf32>
    %cst_43 = arith.constant dense<0.000000e+00> : vector<8xf32>
    %73 = vector.multi_reduction <add>, %72, %cst_43 [1] : vector<8x8xf32> to vector<8xf32>
    %74 = vector.shape_cast %73 : vector<8xf32> to vector<8x1xf32>
    %75 = vector.broadcast %74 : vector<8x1xf32> to vector<8x8xf32>
    %76 = arith.divf %72, %75 : vector<8x8xf32>
    %77 = arith.subf %76, %3 : vector<8x8xf32>
    %cst_44 = arith.constant 1.250000e-01 : f32
    %78 = vector.broadcast %cst_44 : f32 to vector<8x8xf32>
    %79 = arith.mulf %77, %78 : vector<8x8xf32>
    %cst_45 = arith.constant dense<0.000000e+00> : vector<32x8xf32>
    %80 = tpu.matmul %64, %79, %cst_45 {dimension_numbers = #tpu.dot_dimension_numbers<[0], [0], [1], [1], [0, 1, 1, 1], [], []>} : vector<8x32xf32>, vector<8x8xf32>, vector<32x8xf32> -> vector<32x8xf32>
    %cst_46 = arith.constant dense<0.000000e+00> : vector<8xf32>
    %81 = vector.multi_reduction <add>, %79, %cst_46 [0] : vector<8x8xf32> to vector<8xf32>
    %82 = vector.shape_cast %81 : vector<8xf32> to vector<1x8xf32>
    %cst_47 = arith.constant dense<0.000000e+00> : vector<8x32xf32>
    %83 = tpu.matmul %79, %53, %cst_47 {dimension_numbers = #tpu.dot_dimension_numbers<[1], [1], [0], [0], [0, 0, 1, 0], [], []>} : vector<8x8xf32>, vector<32x8xf32>, vector<8x32xf32> -> vector<8x32xf32>
    %cst_48 = arith.constant 0.000000e+00 : f32
    %84 = vector.broadcast %cst_48 : f32 to vector<8x32xf32>
    %85 = arith.cmpf ogt, %62, %84 : vector<8x32xf32>
    %cst_49 = arith.constant 0.000000e+00 : f32
    %86 = vector.broadcast %cst_49 : f32 to vector<8x32xf32>
    %87 = arith.select %85, %83, %86 : vector<8x32xi1>, vector<8x32xf32>
    %cst_50 = arith.constant dense<0.000000e+00> : vector<32x32xf32>
    %88 = tpu.matmul %1, %87, %cst_50 {dimension_numbers = #tpu.dot_dimension_numbers<[0], [0], [1], [1], [0, 1, 1, 1], [], []>} : vector<8x32xf32>, vector<8x32xf32>, vector<32x32xf32> -> vector<32x32xf32>
    %cst_51 = arith.constant dense<0.000000e+00> : vector<32xf32>
    %89 = vector.multi_reduction <add>, %87, %cst_51 [0] : vector<8x32xf32> to vector<32xf32>
    %90 = vector.shape_cast %89 : vector<32xf32> to vector<1x32xf32>
    %cst_52 = arith.constant 1.000000e-01 : f32
    %91 = vector.broadcast %cst_52 : f32 to vector<32x32xf32>
    %92 = arith.mulf %91, %88 : vector<32x32xf32>
    %93 = arith.subf %47, %92 : vector<32x32xf32>
    %cst_53 = arith.constant 1.000000e-01 : f32
    %94 = vector.broadcast %cst_53 : f32 to vector<1x32xf32>
    %95 = arith.mulf %94, %90 : vector<1x32xf32>
    %96 = arith.subf %50, %95 : vector<1x32xf32>
    %cst_54 = arith.constant 1.000000e-01 : f32
    %97 = vector.broadcast %cst_54 : f32 to vector<32x8xf32>
    %98 = arith.mulf %97, %80 : vector<32x8xf32>
    %99 = arith.subf %53, %98 : vector<32x8xf32>
    %cst_55 = arith.constant 1.000000e-01 : f32
    %100 = vector.broadcast %cst_55 : f32 to vector<1x8xf32>
    %101 = arith.mulf %100, %82 : vector<1x8xf32>
    %102 = arith.subf %56, %101 : vector<1x8xf32>
    %cst_56 = arith.constant dense<0.000000e+00> : vector<8x32xf32>
    %103 = tpu.matmul %5, %93, %cst_56 {dimension_numbers = #tpu.dot_dimension_numbers<[1], [0], [0], [1], [0, 0, 1, 1], [], []>} : vector<8x32xf32>, vector<32x32xf32>, vector<8x32xf32> -> vector<8x32xf32>
    %104 = vector.broadcast %96 : vector<1x32xf32> to vector<8x32xf32>
    %105 = arith.addf %103, %104 : vector<8x32xf32>
    %cst_57 = arith.constant 0.000000e+00 : f32
    %106 = vector.broadcast %cst_57 : f32 to vector<8x32xf32>
    %107 = arith.maximumf %105, %106 : vector<8x32xf32>
    %cst_58 = arith.constant dense<0.000000e+00> : vector<8x8xf32>
    %108 = tpu.matmul %107, %99, %cst_58 {dimension_numbers = #tpu.dot_dimension_numbers<[1], [0], [0], [1], [0, 0, 1, 1], [], []>} : vector<8x32xf32>, vector<32x8xf32>, vector<8x8xf32> -> vector<8x8xf32>
    %109 = vector.broadcast %102 : vector<1x8xf32> to vector<8x8xf32>
    %110 = arith.addf %108, %109 : vector<8x8xf32>
    %cst_59 = arith.constant dense<0xFF800000> : vector<8xf32>
    %111 = vector.multi_reduction <maximumf>, %110, %cst_59 [1] : vector<8x8xf32> to vector<8xf32>
    %112 = vector.shape_cast %111 : vector<8xf32> to vector<8x1xf32>
    %113 = vector.broadcast %112 : vector<8x1xf32> to vector<8x8xf32>
    %114 = arith.subf %110, %113 : vector<8x8xf32>
    %115 = math.exp %114 : vector<8x8xf32>
    %cst_60 = arith.constant dense<0.000000e+00> : vector<8xf32>
    %116 = vector.multi_reduction <add>, %115, %cst_60 [1] : vector<8x8xf32> to vector<8xf32>
    %117 = vector.shape_cast %116 : vector<8xf32> to vector<8x1xf32>
    %118 = vector.broadcast %112 : vector<8x1xf32> to vector<8x8xf32>
    %119 = arith.subf %110, %118 : vector<8x8xf32>
    %120 = math.log %117 : vector<8x1xf32>
    %121 = vector.broadcast %120 : vector<8x1xf32> to vector<8x8xf32>
    %122 = arith.subf %119, %121 : vector<8x8xf32>
    %123 = arith.mulf %7, %122 : vector<8x8xf32>
    %124 = vector.shape_cast %123 : vector<8x8xf32> to vector<1x8x8xf32>
    %cst_61 = arith.constant dense<0.000000e+00> : vector<1xf32>
    %125 = vector.multi_reduction <add>, %124, %cst_61 [1, 2] : vector<1x8x8xf32> to vector<1xf32>
    %126 = vector.shape_cast %125 : vector<1xf32> to vector<1x1x1xf32>
    %127 = vector.extract %126[0, 0, 0] : f32 from vector<1x1x1xf32>
    %cst_62 = arith.constant 0.000000e+00 : f32
    %128 = arith.subf %cst_62, %127 : f32
    %cst_63 = arith.constant 1.250000e-01 : f32
    %129 = arith.mulf %128, %cst_63 : f32
    %130 = tpu.iota {dimensions = array<i32: 1>} : vector<8x8xi32>
    %131 = vector.broadcast %112 : vector<8x1xf32> to vector<8x8xf32>
    %132 = arith.cmpf oeq, %110, %131 : vector<8x8xf32>
    %c8_i32 = arith.constant 8 : i32
    %133 = vector.broadcast %c8_i32 : i32 to vector<8x8xi32>
    %134 = arith.select %132, %130, %133 : vector<8x8xi1>, vector<8x8xi32>
    %cst_64 = arith.constant dense<2147483647> : vector<8xi32>
    %135 = vector.multi_reduction <minsi>, %134, %cst_64 [1] : vector<8x8xi32> to vector<8xi32>
    %136 = vector.shape_cast %135 : vector<8xi32> to vector<8x1xi32>
    %137 = arith.cmpi eq, %136, %9 : vector<8x1xi32>
    %138 = arith.extui %137 : vector<8x1xi1> to vector<8x1xi32>
    %139 = vector.shape_cast %138 : vector<8x1xi32> to vector<1x8x1xi32>
    %cst_65 = arith.constant dense<0> : vector<1xi32>
    %140 = vector.multi_reduction <add>, %139, %cst_65 [1, 2] : vector<1x8x1xi32> to vector<1xi32>
    %141 = vector.shape_cast %140 : vector<1xi32> to vector<1x1x1xi32>
    %142 = vector.extract %141[0, 0, 0] : i32 from vector<1x1x1xi32>
    %c0_i32_66 = arith.constant 0 : i32
    %143 = vector.broadcast %c0_i32_66 : i32 to vector<1x3xi32>
    %144 = arith.cmpi eq, %59, %143 : vector<1x3xi32>
    %145 = vector.broadcast %129 : f32 to vector<1x3xf32>
    %146 = arith.select %144, %145, %57 : vector<1x3xi1>, vector<1x3xf32>
    %c0_i32_67 = arith.constant 0 : i32
    %147 = vector.broadcast %c0_i32_67 : i32 to vector<1x3xi32>
    %148 = arith.cmpi eq, %59, %147 : vector<1x3xi32>
    %149 = vector.broadcast %142 : i32 to vector<1x3xi32>
    %150 = arith.select %148, %149, %58 : vector<1x3xi1>, vector<1x3xi32>
    %cst_68 = arith.constant dense<0.000000e+00> : vector<8x32xf32>
    %151 = tpu.matmul %1, %93, %cst_68 {dimension_numbers = #tpu.dot_dimension_numbers<[1], [0], [0], [1], [0, 0, 1, 1], [], []>} : vector<8x32xf32>, vector<32x32xf32>, vector<8x32xf32> -> vector<8x32xf32>
    %152 = vector.broadcast %96 : vector<1x32xf32> to vector<8x32xf32>
    %153 = arith.addf %151, %152 : vector<8x32xf32>
    %cst_69 = arith.constant 0.000000e+00 : f32
    %154 = vector.broadcast %cst_69 : f32 to vector<8x32xf32>
    %155 = arith.maximumf %153, %154 : vector<8x32xf32>
    %cst_70 = arith.constant dense<0.000000e+00> : vector<8x8xf32>
    %156 = tpu.matmul %155, %99, %cst_70 {dimension_numbers = #tpu.dot_dimension_numbers<[1], [0], [0], [1], [0, 0, 1, 1], [], []>} : vector<8x32xf32>, vector<32x8xf32>, vector<8x8xf32> -> vector<8x8xf32>
    %157 = vector.broadcast %102 : vector<1x8xf32> to vector<8x8xf32>
    %158 = arith.addf %156, %157 : vector<8x8xf32>
    %cst_71 = arith.constant dense<0xFF800000> : vector<8xf32>
    %159 = vector.multi_reduction <maximumf>, %158, %cst_71 [1] : vector<8x8xf32> to vector<8xf32>
    %160 = vector.shape_cast %159 : vector<8xf32> to vector<8x1xf32>
    %161 = vector.broadcast %160 : vector<8x1xf32> to vector<8x8xf32>
    %162 = arith.subf %158, %161 : vector<8x8xf32>
    %163 = math.exp %162 : vector<8x8xf32>
    %cst_72 = arith.constant dense<0.000000e+00> : vector<8xf32>
    %164 = vector.multi_reduction <add>, %163, %cst_72 [1] : vector<8x8xf32> to vector<8xf32>
    %165 = vector.shape_cast %164 : vector<8xf32> to vector<8x1xf32>
    %166 = vector.broadcast %165 : vector<8x1xf32> to vector<8x8xf32>
    %167 = arith.divf %163, %166 : vector<8x8xf32>
    %168 = arith.subf %167, %3 : vector<8x8xf32>
    %cst_73 = arith.constant 1.250000e-01 : f32
    %169 = vector.broadcast %cst_73 : f32 to vector<8x8xf32>
    %170 = arith.mulf %168, %169 : vector<8x8xf32>
    %cst_74 = arith.constant dense<0.000000e+00> : vector<32x8xf32>
    %171 = tpu.matmul %155, %170, %cst_74 {dimension_numbers = #tpu.dot_dimension_numbers<[0], [0], [1], [1], [0, 1, 1, 1], [], []>} : vector<8x32xf32>, vector<8x8xf32>, vector<32x8xf32> -> vector<32x8xf32>
    %cst_75 = arith.constant dense<0.000000e+00> : vector<8xf32>
    %172 = vector.multi_reduction <add>, %170, %cst_75 [0] : vector<8x8xf32> to vector<8xf32>
    %173 = vector.shape_cast %172 : vector<8xf32> to vector<1x8xf32>
    %cst_76 = arith.constant dense<0.000000e+00> : vector<8x32xf32>
    %174 = tpu.matmul %170, %99, %cst_76 {dimension_numbers = #tpu.dot_dimension_numbers<[1], [1], [0], [0], [0, 0, 1, 0], [], []>} : vector<8x8xf32>, vector<32x8xf32>, vector<8x32xf32> -> vector<8x32xf32>
    %cst_77 = arith.constant 0.000000e+00 : f32
    %175 = vector.broadcast %cst_77 : f32 to vector<8x32xf32>
    %176 = arith.cmpf ogt, %153, %175 : vector<8x32xf32>
    %cst_78 = arith.constant 0.000000e+00 : f32
    %177 = vector.broadcast %cst_78 : f32 to vector<8x32xf32>
    %178 = arith.select %176, %174, %177 : vector<8x32xi1>, vector<8x32xf32>
    %cst_79 = arith.constant dense<0.000000e+00> : vector<32x32xf32>
    %179 = tpu.matmul %1, %178, %cst_79 {dimension_numbers = #tpu.dot_dimension_numbers<[0], [0], [1], [1], [0, 1, 1, 1], [], []>} : vector<8x32xf32>, vector<8x32xf32>, vector<32x32xf32> -> vector<32x32xf32>
    %cst_80 = arith.constant dense<0.000000e+00> : vector<32xf32>
    %180 = vector.multi_reduction <add>, %178, %cst_80 [0] : vector<8x32xf32> to vector<32xf32>
    %181 = vector.shape_cast %180 : vector<32xf32> to vector<1x32xf32>
    %cst_81 = arith.constant 1.000000e-01 : f32
    %182 = vector.broadcast %cst_81 : f32 to vector<32x32xf32>
    %183 = arith.mulf %182, %179 : vector<32x32xf32>
    %184 = arith.subf %93, %183 : vector<32x32xf32>
    %cst_82 = arith.constant 1.000000e-01 : f32
    %185 = vector.broadcast %cst_82 : f32 to vector<1x32xf32>
    %186 = arith.mulf %185, %181 : vector<1x32xf32>
    %187 = arith.subf %96, %186 : vector<1x32xf32>
    %cst_83 = arith.constant 1.000000e-01 : f32
    %188 = vector.broadcast %cst_83 : f32 to vector<32x8xf32>
    %189 = arith.mulf %188, %171 : vector<32x8xf32>
    %190 = arith.subf %99, %189 : vector<32x8xf32>
    %cst_84 = arith.constant 1.000000e-01 : f32
    %191 = vector.broadcast %cst_84 : f32 to vector<1x8xf32>
    %192 = arith.mulf %191, %173 : vector<1x8xf32>
    %193 = arith.subf %102, %192 : vector<1x8xf32>
    %cst_85 = arith.constant dense<0.000000e+00> : vector<8x32xf32>
    %194 = tpu.matmul %5, %184, %cst_85 {dimension_numbers = #tpu.dot_dimension_numbers<[1], [0], [0], [1], [0, 0, 1, 1], [], []>} : vector<8x32xf32>, vector<32x32xf32>, vector<8x32xf32> -> vector<8x32xf32>
    %195 = vector.broadcast %187 : vector<1x32xf32> to vector<8x32xf32>
    %196 = arith.addf %194, %195 : vector<8x32xf32>
    %cst_86 = arith.constant 0.000000e+00 : f32
    %197 = vector.broadcast %cst_86 : f32 to vector<8x32xf32>
    %198 = arith.maximumf %196, %197 : vector<8x32xf32>
    %cst_87 = arith.constant dense<0.000000e+00> : vector<8x8xf32>
    %199 = tpu.matmul %198, %190, %cst_87 {dimension_numbers = #tpu.dot_dimension_numbers<[1], [0], [0], [1], [0, 0, 1, 1], [], []>} : vector<8x32xf32>, vector<32x8xf32>, vector<8x8xf32> -> vector<8x8xf32>
    %200 = vector.broadcast %193 : vector<1x8xf32> to vector<8x8xf32>
    %201 = arith.addf %199, %200 : vector<8x8xf32>
    %cst_88 = arith.constant dense<0xFF800000> : vector<8xf32>
    %202 = vector.multi_reduction <maximumf>, %201, %cst_88 [1] : vector<8x8xf32> to vector<8xf32>
    %203 = vector.shape_cast %202 : vector<8xf32> to vector<8x1xf32>
    %204 = vector.broadcast %203 : vector<8x1xf32> to vector<8x8xf32>
    %205 = arith.subf %201, %204 : vector<8x8xf32>
    %206 = math.exp %205 : vector<8x8xf32>
    %cst_89 = arith.constant dense<0.000000e+00> : vector<8xf32>
    %207 = vector.multi_reduction <add>, %206, %cst_89 [1] : vector<8x8xf32> to vector<8xf32>
    %208 = vector.shape_cast %207 : vector<8xf32> to vector<8x1xf32>
    %209 = vector.broadcast %203 : vector<8x1xf32> to vector<8x8xf32>
    %210 = arith.subf %201, %209 : vector<8x8xf32>
    %211 = math.log %208 : vector<8x1xf32>
    %212 = vector.broadcast %211 : vector<8x1xf32> to vector<8x8xf32>
    %213 = arith.subf %210, %212 : vector<8x8xf32>
    %214 = arith.mulf %7, %213 : vector<8x8xf32>
    %215 = vector.shape_cast %214 : vector<8x8xf32> to vector<1x8x8xf32>
    %cst_90 = arith.constant dense<0.000000e+00> : vector<1xf32>
    %216 = vector.multi_reduction <add>, %215, %cst_90 [1, 2] : vector<1x8x8xf32> to vector<1xf32>
    %217 = vector.shape_cast %216 : vector<1xf32> to vector<1x1x1xf32>
    %218 = vector.extract %217[0, 0, 0] : f32 from vector<1x1x1xf32>
    %cst_91 = arith.constant 0.000000e+00 : f32
    %219 = arith.subf %cst_91, %218 : f32
    %cst_92 = arith.constant 1.250000e-01 : f32
    %220 = arith.mulf %219, %cst_92 : f32
    %221 = tpu.iota {dimensions = array<i32: 1>} : vector<8x8xi32>
    %222 = vector.broadcast %203 : vector<8x1xf32> to vector<8x8xf32>
    %223 = arith.cmpf oeq, %201, %222 : vector<8x8xf32>
    %c8_i32_93 = arith.constant 8 : i32
    %224 = vector.broadcast %c8_i32_93 : i32 to vector<8x8xi32>
    %225 = arith.select %223, %221, %224 : vector<8x8xi1>, vector<8x8xi32>
    %cst_94 = arith.constant dense<2147483647> : vector<8xi32>
    %226 = vector.multi_reduction <minsi>, %225, %cst_94 [1] : vector<8x8xi32> to vector<8xi32>
    %227 = vector.shape_cast %226 : vector<8xi32> to vector<8x1xi32>
    %228 = arith.cmpi eq, %227, %9 : vector<8x1xi32>
    %229 = arith.extui %228 : vector<8x1xi1> to vector<8x1xi32>
    %230 = vector.shape_cast %229 : vector<8x1xi32> to vector<1x8x1xi32>
    %cst_95 = arith.constant dense<0> : vector<1xi32>
    %231 = vector.multi_reduction <add>, %230, %cst_95 [1, 2] : vector<1x8x1xi32> to vector<1xi32>
    %232 = vector.shape_cast %231 : vector<1xi32> to vector<1x1x1xi32>
    %233 = vector.extract %232[0, 0, 0] : i32 from vector<1x1x1xi32>
    %c1_i32 = arith.constant 1 : i32
    %234 = vector.broadcast %c1_i32 : i32 to vector<1x3xi32>
    %235 = arith.cmpi eq, %59, %234 : vector<1x3xi32>
    %236 = vector.broadcast %220 : f32 to vector<1x3xf32>
    %237 = arith.select %235, %236, %146 : vector<1x3xi1>, vector<1x3xf32>
    %c1_i32_96 = arith.constant 1 : i32
    %238 = vector.broadcast %c1_i32_96 : i32 to vector<1x3xi32>
    %239 = arith.cmpi eq, %59, %238 : vector<1x3xi32>
    %240 = vector.broadcast %233 : i32 to vector<1x3xi32>
    %241 = arith.select %239, %240, %150 : vector<1x3xi1>, vector<1x3xi32>
    %cst_97 = arith.constant dense<0.000000e+00> : vector<8x32xf32>
    %242 = tpu.matmul %1, %184, %cst_97 {dimension_numbers = #tpu.dot_dimension_numbers<[1], [0], [0], [1], [0, 0, 1, 1], [], []>} : vector<8x32xf32>, vector<32x32xf32>, vector<8x32xf32> -> vector<8x32xf32>
    %243 = vector.broadcast %187 : vector<1x32xf32> to vector<8x32xf32>
    %244 = arith.addf %242, %243 : vector<8x32xf32>
    %cst_98 = arith.constant 0.000000e+00 : f32
    %245 = vector.broadcast %cst_98 : f32 to vector<8x32xf32>
    %246 = arith.maximumf %244, %245 : vector<8x32xf32>
    %cst_99 = arith.constant dense<0.000000e+00> : vector<8x8xf32>
    %247 = tpu.matmul %246, %190, %cst_99 {dimension_numbers = #tpu.dot_dimension_numbers<[1], [0], [0], [1], [0, 0, 1, 1], [], []>} : vector<8x32xf32>, vector<32x8xf32>, vector<8x8xf32> -> vector<8x8xf32>
    %248 = vector.broadcast %193 : vector<1x8xf32> to vector<8x8xf32>
    %249 = arith.addf %247, %248 : vector<8x8xf32>
    %cst_100 = arith.constant dense<0xFF800000> : vector<8xf32>
    %250 = vector.multi_reduction <maximumf>, %249, %cst_100 [1] : vector<8x8xf32> to vector<8xf32>
    %251 = vector.shape_cast %250 : vector<8xf32> to vector<8x1xf32>
    %252 = vector.broadcast %251 : vector<8x1xf32> to vector<8x8xf32>
    %253 = arith.subf %249, %252 : vector<8x8xf32>
    %254 = math.exp %253 : vector<8x8xf32>
    %cst_101 = arith.constant dense<0.000000e+00> : vector<8xf32>
    %255 = vector.multi_reduction <add>, %254, %cst_101 [1] : vector<8x8xf32> to vector<8xf32>
    %256 = vector.shape_cast %255 : vector<8xf32> to vector<8x1xf32>
    %257 = vector.broadcast %256 : vector<8x1xf32> to vector<8x8xf32>
    %258 = arith.divf %254, %257 : vector<8x8xf32>
    %259 = arith.subf %258, %3 : vector<8x8xf32>
    %cst_102 = arith.constant 1.250000e-01 : f32
    %260 = vector.broadcast %cst_102 : f32 to vector<8x8xf32>
    %261 = arith.mulf %259, %260 : vector<8x8xf32>
    %cst_103 = arith.constant dense<0.000000e+00> : vector<32x8xf32>
    %262 = tpu.matmul %246, %261, %cst_103 {dimension_numbers = #tpu.dot_dimension_numbers<[0], [0], [1], [1], [0, 1, 1, 1], [], []>} : vector<8x32xf32>, vector<8x8xf32>, vector<32x8xf32> -> vector<32x8xf32>
    %cst_104 = arith.constant dense<0.000000e+00> : vector<8xf32>
    %263 = vector.multi_reduction <add>, %261, %cst_104 [0] : vector<8x8xf32> to vector<8xf32>
    %264 = vector.shape_cast %263 : vector<8xf32> to vector<1x8xf32>
    %cst_105 = arith.constant dense<0.000000e+00> : vector<8x32xf32>
    %265 = tpu.matmul %261, %190, %cst_105 {dimension_numbers = #tpu.dot_dimension_numbers<[1], [1], [0], [0], [0, 0, 1, 0], [], []>} : vector<8x8xf32>, vector<32x8xf32>, vector<8x32xf32> -> vector<8x32xf32>
    %cst_106 = arith.constant 0.000000e+00 : f32
    %266 = vector.broadcast %cst_106 : f32 to vector<8x32xf32>
    %267 = arith.cmpf ogt, %244, %266 : vector<8x32xf32>
    %cst_107 = arith.constant 0.000000e+00 : f32
    %268 = vector.broadcast %cst_107 : f32 to vector<8x32xf32>
    %269 = arith.select %267, %265, %268 : vector<8x32xi1>, vector<8x32xf32>
    %cst_108 = arith.constant dense<0.000000e+00> : vector<32x32xf32>
    %270 = tpu.matmul %1, %269, %cst_108 {dimension_numbers = #tpu.dot_dimension_numbers<[0], [0], [1], [1], [0, 1, 1, 1], [], []>} : vector<8x32xf32>, vector<8x32xf32>, vector<32x32xf32> -> vector<32x32xf32>
    %cst_109 = arith.constant dense<0.000000e+00> : vector<32xf32>
    %271 = vector.multi_reduction <add>, %269, %cst_109 [0] : vector<8x32xf32> to vector<32xf32>
    %272 = vector.shape_cast %271 : vector<32xf32> to vector<1x32xf32>
    %cst_110 = arith.constant 1.000000e-01 : f32
    %273 = vector.broadcast %cst_110 : f32 to vector<32x32xf32>
    %274 = arith.mulf %273, %270 : vector<32x32xf32>
    %275 = arith.subf %184, %274 : vector<32x32xf32>
    %cst_111 = arith.constant 1.000000e-01 : f32
    %276 = vector.broadcast %cst_111 : f32 to vector<1x32xf32>
    %277 = arith.mulf %276, %272 : vector<1x32xf32>
    %278 = arith.subf %187, %277 : vector<1x32xf32>
    %cst_112 = arith.constant 1.000000e-01 : f32
    %279 = vector.broadcast %cst_112 : f32 to vector<32x8xf32>
    %280 = arith.mulf %279, %262 : vector<32x8xf32>
    %281 = arith.subf %190, %280 : vector<32x8xf32>
    %cst_113 = arith.constant 1.000000e-01 : f32
    %282 = vector.broadcast %cst_113 : f32 to vector<1x8xf32>
    %283 = arith.mulf %282, %264 : vector<1x8xf32>
    %284 = arith.subf %193, %283 : vector<1x8xf32>
    %cst_114 = arith.constant dense<0.000000e+00> : vector<8x32xf32>
    %285 = tpu.matmul %5, %275, %cst_114 {dimension_numbers = #tpu.dot_dimension_numbers<[1], [0], [0], [1], [0, 0, 1, 1], [], []>} : vector<8x32xf32>, vector<32x32xf32>, vector<8x32xf32> -> vector<8x32xf32>
    %286 = vector.broadcast %278 : vector<1x32xf32> to vector<8x32xf32>
    %287 = arith.addf %285, %286 : vector<8x32xf32>
    %cst_115 = arith.constant 0.000000e+00 : f32
    %288 = vector.broadcast %cst_115 : f32 to vector<8x32xf32>
    %289 = arith.maximumf %287, %288 : vector<8x32xf32>
    %cst_116 = arith.constant dense<0.000000e+00> : vector<8x8xf32>
    %290 = tpu.matmul %289, %281, %cst_116 {dimension_numbers = #tpu.dot_dimension_numbers<[1], [0], [0], [1], [0, 0, 1, 1], [], []>} : vector<8x32xf32>, vector<32x8xf32>, vector<8x8xf32> -> vector<8x8xf32>
    %291 = vector.broadcast %284 : vector<1x8xf32> to vector<8x8xf32>
    %292 = arith.addf %290, %291 : vector<8x8xf32>
    %cst_117 = arith.constant dense<0xFF800000> : vector<8xf32>
    %293 = vector.multi_reduction <maximumf>, %292, %cst_117 [1] : vector<8x8xf32> to vector<8xf32>
    %294 = vector.shape_cast %293 : vector<8xf32> to vector<8x1xf32>
    %295 = vector.broadcast %294 : vector<8x1xf32> to vector<8x8xf32>
    %296 = arith.subf %292, %295 : vector<8x8xf32>
    %297 = math.exp %296 : vector<8x8xf32>
    %cst_118 = arith.constant dense<0.000000e+00> : vector<8xf32>
    %298 = vector.multi_reduction <add>, %297, %cst_118 [1] : vector<8x8xf32> to vector<8xf32>
    %299 = vector.shape_cast %298 : vector<8xf32> to vector<8x1xf32>
    %300 = vector.broadcast %294 : vector<8x1xf32> to vector<8x8xf32>
    %301 = arith.subf %292, %300 : vector<8x8xf32>
    %302 = math.log %299 : vector<8x1xf32>
    %303 = vector.broadcast %302 : vector<8x1xf32> to vector<8x8xf32>
    %304 = arith.subf %301, %303 : vector<8x8xf32>
    %305 = arith.mulf %7, %304 : vector<8x8xf32>
    %306 = vector.shape_cast %305 : vector<8x8xf32> to vector<1x8x8xf32>
    %cst_119 = arith.constant dense<0.000000e+00> : vector<1xf32>
    %307 = vector.multi_reduction <add>, %306, %cst_119 [1, 2] : vector<1x8x8xf32> to vector<1xf32>
    %308 = vector.shape_cast %307 : vector<1xf32> to vector<1x1x1xf32>
    %309 = vector.extract %308[0, 0, 0] : f32 from vector<1x1x1xf32>
    %cst_120 = arith.constant 0.000000e+00 : f32
    %310 = arith.subf %cst_120, %309 : f32
    %cst_121 = arith.constant 1.250000e-01 : f32
    %311 = arith.mulf %310, %cst_121 : f32
    %312 = tpu.iota {dimensions = array<i32: 1>} : vector<8x8xi32>
    %313 = vector.broadcast %294 : vector<8x1xf32> to vector<8x8xf32>
    %314 = arith.cmpf oeq, %292, %313 : vector<8x8xf32>
    %c8_i32_122 = arith.constant 8 : i32
    %315 = vector.broadcast %c8_i32_122 : i32 to vector<8x8xi32>
    %316 = arith.select %314, %312, %315 : vector<8x8xi1>, vector<8x8xi32>
    %cst_123 = arith.constant dense<2147483647> : vector<8xi32>
    %317 = vector.multi_reduction <minsi>, %316, %cst_123 [1] : vector<8x8xi32> to vector<8xi32>
    %318 = vector.shape_cast %317 : vector<8xi32> to vector<8x1xi32>
    %319 = arith.cmpi eq, %318, %9 : vector<8x1xi32>
    %320 = arith.extui %319 : vector<8x1xi1> to vector<8x1xi32>
    %321 = vector.shape_cast %320 : vector<8x1xi32> to vector<1x8x1xi32>
    %cst_124 = arith.constant dense<0> : vector<1xi32>
    %322 = vector.multi_reduction <add>, %321, %cst_124 [1, 2] : vector<1x8x1xi32> to vector<1xi32>
    %323 = vector.shape_cast %322 : vector<1xi32> to vector<1x1x1xi32>
    %324 = vector.extract %323[0, 0, 0] : i32 from vector<1x1x1xi32>
    %c2_i32 = arith.constant 2 : i32
    %325 = vector.broadcast %c2_i32 : i32 to vector<1x3xi32>
    %326 = arith.cmpi eq, %59, %325 : vector<1x3xi32>
    %327 = vector.broadcast %311 : f32 to vector<1x3xf32>
    %328 = arith.select %326, %327, %237 : vector<1x3xi1>, vector<1x3xf32>
    %c2_i32_125 = arith.constant 2 : i32
    %329 = vector.broadcast %c2_i32_125 : i32 to vector<1x3xi32>
    %330 = arith.cmpi eq, %59, %329 : vector<1x3xi32>
    %331 = vector.broadcast %324 : i32 to vector<1x3xi32>
    %332 = arith.select %330, %331, %241 : vector<1x3xi1>, vector<1x3xi32>
    %c0_126 = arith.constant 0 : index
    %c0_127 = arith.constant 0 : index
    %c0_128 = arith.constant 0 : index
    %333 = vector.load %arg10[%c0_126, %c0_127, %c0_128] : memref<1x1x3xf32, #tpu.memory_space<vmem>>, vector<1x1x3xf32>
    %334 = vector.shape_cast %333 : vector<1x1x3xf32> to vector<1x3xf32>
    %335 = vector.shape_cast %328 : vector<1x3xf32> to vector<1x1x3xf32>
    tpu.vector_store %arg10[%c0_126, %c0_127, %c0_128], %335 {strides = array<i32>} : memref<1x1x3xf32, #tpu.memory_space<vmem>>, vector<1x1x3xf32>,
    %c0_129 = arith.constant 0 : index
    %c0_130 = arith.constant 0 : index
    %c0_131 = arith.constant 0 : index
    %336 = vector.load %arg11[%c0_129, %c0_130, %c0_131] : memref<1x1x3xi32, #tpu.memory_space<vmem>>, vector<1x1x3xi32>
    %337 = vector.shape_cast %336 : vector<1x1x3xi32> to vector<1x3xi32>
    %338 = vector.shape_cast %332 : vector<1x3xi32> to vector<1x1x3xi32>
    tpu.vector_store %arg11[%c0_129, %c0_130, %c0_131], %338 {strides = array<i32>} : memref<1x1x3xi32, #tpu.memory_space<vmem>>, vector<1x1x3xi32>,
    return
  }
  func.func @transform_0(%arg0: i32) -> (i32, i32, i32) {
    %c0_i32 = arith.constant 0 : i32
    %c0_i32_0 = arith.constant 0 : i32
    %c0_i32_1 = arith.constant 0 : i32
    return %arg0, %c0_i32, %c0_i32_0 : i32, i32, i32
  }
  func.func @transform_1(%arg0: i32) -> (i32, i32, i32) {
    %c0_i32 = arith.constant 0 : i32
    %c0_i32_0 = arith.constant 0 : i32
    %c0_i32_1 = arith.constant 0 : i32
    return %arg0, %c0_i32, %c0_i32_0 : i32, i32, i32
  }
  func.func @transform_2(%arg0: i32) -> (i32, i32, i32) {
    %c0_i32 = arith.constant 0 : i32
    %c0_i32_0 = arith.constant 0 : i32
    %c0_i32_1 = arith.constant 0 : i32
    return %arg0, %c0_i32, %c0_i32_0 : i32, i32, i32
  }
  func.func @transform_3(%arg0: i32) -> (i32, i32, i32) {
    %c0_i32 = arith.constant 0 : i32
    %c0_i32_0 = arith.constant 0 : i32
    %c0_i32_1 = arith.constant 0 : i32
    return %arg0, %c0_i32, %c0_i32_0 : i32, i32, i32
  }
  func.func @transform_4(%arg0: i32) -> (i32, i32, i32) {
    %c0_i32 = arith.constant 0 : i32
    %c0_i32_0 = arith.constant 0 : i32
    %c0_i32_1 = arith.constant 0 : i32
    return %arg0, %c0_i32, %c0_i32_0 : i32, i32, i32
  }
  func.func @transform_5(%arg0: i32) -> (i32, i32) {
    %c0_i32 = arith.constant 0 : i32
    %c0_i32_0 = arith.constant 0 : i32
    %c0_i32_1 = arith.constant 0 : i32
    return %c0_i32, %c0_i32_0 : i32, i32
  }
  func.func @transform_6(%arg0: i32) -> (i32, i32) {
    %c0_i32 = arith.constant 0 : i32
    %c0_i32_0 = arith.constant 0 : i32
    %c0_i32_1 = arith.constant 0 : i32
    return %c0_i32, %c0_i32_0 : i32, i32
  }
  func.func @transform_7(%arg0: i32) -> (i32, i32) {
    %c0_i32 = arith.constant 0 : i32
    %c0_i32_0 = arith.constant 0 : i32
    %c0_i32_1 = arith.constant 0 : i32
    return %c0_i32, %c0_i32_0 : i32, i32
  }
  func.func @transform_8(%arg0: i32) -> (i32, i32) {
    %c0_i32 = arith.constant 0 : i32
    %c0_i32_0 = arith.constant 0 : i32
    %c0_i32_1 = arith.constant 0 : i32
    return %c0_i32, %c0_i32_0 : i32, i32
  }
  func.func @transform_9(%arg0: i32) -> (i32, i32, i32) {
    %c0_i32 = arith.constant 0 : i32
    %c0_i32_0 = arith.constant 0 : i32
    %c0_i32_1 = arith.constant 0 : i32
    return %arg0, %c0_i32, %c0_i32_0 : i32, i32, i32
  }
  func.func @transform_10(%arg0: i32) -> (i32, i32, i32) {
    %c0_i32 = arith.constant 0 : i32
    %c0_i32_0 = arith.constant 0 : i32
    %c0_i32_1 = arith.constant 0 : i32
    return %arg0, %c0_i32, %c0_i32_0 : i32, i32, i32
  }
}

</mosaic_0001>

<bundles_post_ra>
// kernel: run.1
= control target key start
LH: loop header
LB: loop body
LE: loop exit
PB: predicated region body
PF: predicated region fallthrough
CT: control target
= control target key end

     0   :  { %s3881_s13 = smov 0   ;;  %s4486_s0 = inlined_call_operand.vmem [shape: f32[2,8,32], index: 0, kind: input, shape index: {}]   ;;  %s4487_s1 = inlined_call_operand.vmem [shape: f32[2,8,8], index: 1, kind: input, shape index: {}]   ;;  %s4488_s2 = inlined_call_operand.vmem [shape: f32[2,8,32], index: 2, kind: input, shape index: {}]   ;;  %s4489_s3 = inlined_call_operand.vmem [shape: f32[2,8,8], index: 3, kind: input, shape index: {}]   ;;  %s4490_s4 = inlined_call_operand.vmem [shape: s32[2,8,1], index: 4, kind: input, shape index: {}]   ;;  %s4491_s5 = inlined_call_operand.vmem [shape: f32[32,32], index: 5, kind: input, shape index: {}]   ;;  %s4492_s6 = inlined_call_operand.vmem [shape: f32[1,32], index: 6, kind: input, shape index: {}]   ;;  %s4493_s7 = inlined_call_operand.vmem [shape: f32[32,8], index: 7, kind: input, shape index: {}]   ;;  %s4494_s8 = inlined_call_operand.vmem [shape: f32[1,8], index: 8, kind: input, shape index: {}]   ;;  %s4495_s9 = inlined_call_operand.vmem [shape: f32[2,1,3], index: 9, kind: output, shape index: {0}]   ;;  %s4496_s10 = inlined_call_operand.vmem [shape: s32[2,1,3], index: 10, kind: output, shape index: {1}]  }
   0x1 LB: > { %s3290_s14 = sadd.s32 4294967295, %s3821_s13   ;;  %p3294_p0 = scmp.ge.s32.totalorder %s3821_s13, 1  ;;  %s3821_s13 = sphi %s3881_s13, %s21_s13  }
   0x2   : > { %p350_p1 = scmp.lt.s32.totalorder %s3821_s13, 3 }
   0x4   : > { %p351_p2 = pnand %p3294_p0, %p350_p1 }
   0x5   : > { %p404_p3 = scmp.lt.s32.totalorder (!%p351_p2), %s3290_s14, 1 }
   0x6   : > { %354 = sbr.rel (%p351_p2) target bundleno = 5586 (0x15d2), region = 56 }
   0xb   : > { %v3892_v0 = vld [vmem:[%s4491_s5 + $0x18] sm:$0xff]  ;;  %v3823_v1 = vmov 0.0   ;;  %v3898_v2 = vld [vmem:[%s4491_s5 + $0x10] sm:$0xff]  ;;  %vm3824_vm0 = vmmov 0   ;;  %s4498_s14 = smov (!%p404_p3, %s3290_s14), 1  ;;  %v3915_v4 = vld [vmem:[%s4491_s5 + $0x8] sm:$0xff]  ;;  %v446_v10 = vlaneseq }
   0xc   : > { %3502 = vmatprep.subr.mxu0 %v3823_v1  ;;  %3510 = vmatprep.mubr.msk.f32.mxu0 %vm3824_vm0, %v3823_v1  ;;  %v3905_v3 = vld [vmem:[%s4493_s7 + $0x18] sm:$0xff]  ;;  %s3920_s23 = sshll.u32 %s4498_s14, 3  ;;  %v3927_v5 = vld [vmem:[%s4491_s5] sm:$0xff]  ;;  %vm451_vm1 = vcmask 261120   ;;  %v3945_v7 = vld [vmem:[%s4493_s7 + $0x10] sm:$0xff]  ;;  %vm605_vm2 = vcmask 64512  }
   0xd   : > { %3503 = vmatpush3.msra.mxu0 %v3892_v0  ;;  %3513 = vmatprep.subr.mxu1 %v3823_v1  ;;  %s407_s28 = scalar_lea.vmem %s4486_s0, %s3920_s23  ;;  %v3952_v8 = vld [vmem:[%s4493_s7 + $0x8] sm:$0xff]  ;;  %v3959_v9 = vld [vmem:[%s4493_s7] sm:$0xff]  ;;  %v447_v11 = vshrl.u32 %v446_v10, 7  ;;  %s411_s24 = scalar_lea.vmem %s4487_s1, %s3920_s23  ;;  %vm1707_vm13 = vcmask 7168  }
   0xe   : > { %3504 = vmatprep.subr.mxu0 %v3823_v1  ;;  %3514 = vmatpush3.msra.mxu1 %v3905_v3  ;;  %v3936_v6 = vld [vmem:[%s407_s28] sm:$0xff]  ;;  %s415_s27 = scalar_lea.vmem %s4488_s2, %s3920_s23  ;;  %s423_s30 = scalar_lea.vmem %s4490_s4, %s3920_s23 }
   0xf   : > { %3505 = vmatpush3.msra.mxu0 %v3898_v2  ;;  %3515 = vmatprep.subr.mxu1 %v3823_v1  ;;  %v3964_v12 = vsub.s32 0, %v447_v11  ;;  %v3969_v13 = vld [vmem:[%s4492_s6] sm:$0x1]  ;;  %s419_s15 = scalar_lea.vmem %s4489_s3, %s3920_s23  ;;  %s429_s28 = scalar_lea.vmem %s4496_s10, %s4498_s14 }
  0x10   : > { %3506 = vmatprep.subr.mxu0 %v3823_v1  ;;  %3521 = vmatprep.mubr.msk.f32.mxu1 %vm3824_vm0, %v3823_v1  ;;  %v3992_v19 = vld [vmem:[%s4494_s8] sm:$0x1] }
  0x11   : > { %3507 = vmatpush3.msra.mxu0 %v3915_v4  ;;  %3516 = vmatpush3.msra.mxu1 %v3945_v7  ;;  %v449_v14 = vrot.slane %v3969_v13, %v3964_v12  ;;  %v530_v20 = vrot.slane %v3992_v19, %v3964_v12  ;;  %v4003_v34 = vld [vmem:[%s411_s24] sm:$0xff] }
  0x12   : > { %3508 = vmatprep.subr.mxu0 %v3823_v1  ;;  %3517 = vmatprep.subr.mxu1 %v3823_v1 }
  0x13   : > { %3509 = vmatpush3.msra.mxu0 %v3927_v5  ;;  %3518 = vmatpush3.msra.mxu1 %v3952_v8 }
  0x14   : > { %3511 = vmatmul.mubr.msk.f32.vlgmr.msra.gmra.mxu0 %vm451_vm1, %v3936_v6  ;;  %3519 = vmatprep.subr.mxu1 %v3823_v1 }
  0x15   : > { %3520 = vmatpush3.msra.mxu1 %v3959_v9 }
  0x16   : > { %3532 = vmatprep.subr.mxu1 %v3823_v1 }
  0xd4   : > { %v521_v15 = vpop.f32.mrf.mxu0 }
  0xd5   : > { %v522_v16 = vadd.f32 %v521_v15, %v449_v14 }
  0xd6   : > { %v3512_v17 = vpop.f32.mrf.mxu0 }
  0xd7   : > { %v525_v18 = vmax.f32 %v522_v16, 0.0  ;;  %vm840_vm3 = vcmp.gt.f32.partialorder %v522_v16, 0.0 }
  0xd9   : > { %619 = vxpose.xlu1.b32.start.end [1/1] (short) (narrow) %v525_v18, 32  ;;  %3522 = vmatmul.mubr.msk.f32.vlgmr.msra.gmra.mxu1 %vm451_vm1, %v525_v18 }
  0xda   : > { %3540 = vmatprep.mubr.msk.f32.mxu1 %vm3824_vm0, %v3823_v1  ;;  %3533 = vmatpush3.xpose.msk.msra.mxu1 %vm605_vm2, %v3905_v3 }
  0xdb   : > { %3534 = vmatprep.subr.mxu1 %v3823_v1 }
  0xde   : > { %3535 = vmatpush3.xpose.msk.msra.mxu1 %vm605_vm2, %v3945_v7 }
  0xdf   : > { %3536 = vmatprep.subr.mxu1 %v3823_v1 }
  0xe2   : > { %3537 = vmatpush3.xpose.msk.msra.mxu1 %vm605_vm2, %v3952_v8 }
  0xe3   : > { %3538 = vmatprep.subr.mxu1 %v3823_v1 }
  0xe6   : > { %842 = vxpose.xlu1.b32.start.end [1/1] (short) (narrow) %v3936_v6, 32  ;;  %3539 = vmatpush3.xpose.msk.msra.mxu1 %vm605_vm2, %v3959_v9 }
  0xe7   : > { %3562 = vmatprep.subr.mxu1 %v3823_v1 }
 0x155   : > { %v635_v30 = vpop.trf.xlu1 }
 0x156   : > { %3526 = vmatprep.mubr.msk.f32.mxu0 %vm605_vm2, %v635_v30 }
 0x159   : > { %v636_v32 = vpop.trf.xlu1 }
 0x15d   : > { %v637_v36 = vpop.trf.xlu1 }
 0x161   : > { %v638_v39 = vpop.trf.xlu1 }
 0x165   : > { %v4016_v40 = vpop.trf.xlu1 }
 0x169   : > { %v4021_v41 = vpop.trf.xlu1 }
 0x16d   : > { %v4023_v42 = vpop.trf.xlu1 }
 0x171   : > { %v4028_v47 = vpop.trf.xlu1 }
 0x199   : > { %v601_v21 = vpop.f32.mrf.mxu1 }
 0x19a   : > { %v602_v22 = vadd.f32 %v601_v21, %v530_v20 }
 0x19b   : > { %v3523_v23 = vpop.f32.mrf.mxu1 }
 0x19c   : > { %v606_v24 = vsel %vm605_vm2, %v602_v22, -inf }
 0x19d   : > { %607 = vmax.xlane.f32.xlu0 %v606_v24 }
 0x226   : > { %v608_v25 = vpop.xlane.xlu0 %607 }
 0x227   : > { %v609_v26 = vsub.f32 %v602_v22, %v608_v25 }
 0x229   : > { %v610_v27 = vmul.f32 1.442695, %v609_v26 }
 0x22b   : > { %3787 = vpow2.f32 %v610_v27 }
 0x238   : > { %v3788_v28 = vpop.eup %3787 }
 0x239   : > { %v612_v29 = vsel %vm605_vm2, %v3788_v28, 0.0 }
 0x23a   : > { %613 = vadd.xlane.f32.xlu0 %v612_v29 }
 0x2c3   : > { %v614_v31 = vpop.xlane.xlu0 %613 }
 0x2c4   : > { %3789 = vrcp.f32 %v614_v31 }
 0x2d1   : > { %v3790_v33 = vpop.eup %3789 }
 0x2d2   : > { %v616_v35 = vmul.f32 %v3790_v33, %v3788_v28 }
 0x2d4   : > { %v617_v37 = vsub.f32 %v616_v35, %v4003_v34 }
 0x2d6   : > { %v4006_v38 = vmul.f32 0.125, %v617_v37 }
 0x2d8   : > { %3524 = vmatprep.subr.mxu0 %v4006_v38  ;;  %3541 = vmatmul.mubr.msk.f32.vlgmr.msra.gmra.mxu1 %vm605_vm2, %v4006_v38  ;;  %v748_v27 = vsel %vm605_vm2, %v4006_v38, 0.0 }
 0x2d9   : > { %3525 = vmatpush3.msra.mxu0 %v4006_v38  ;;  %3570 = vmatprep.mubr.msk.f32.mxu1 %vm3824_vm0, %v3823_v1  ;;  %v749_v28 = vrot.slane %v748_v27, 4 }
 0x2da   : > { %3527 = vmatmul.mubr.msk.f32.vlgmr.msra.gmra.mxu0 %vm605_vm2, %v636_v32 }
 0x2db   : > { %3529 = vmatprep.mubr.msk.f32.mxu0 %vm605_vm2, %v637_v36 }
 0x2de   : > { %3530 = vmatmul.mubr.msk.f32.gmra.mxu0 %vm605_vm2, %v638_v39 }
 0x2df   : > { %3545 = vmatprep.mubr.msk.f32.mxu0 %vm605_vm2, %v4016_v40 }
 0x398   : > { %v836_v43 = vpop.f32.mrf.mxu1 }
 0x399   : > { %v841_v44 = vsel %vm840_vm3, %v836_v43, 0.0  ;;  %3543 = vmatprep.subr.msk.mxu0 %vm840_vm3, %v836_v43 }
 0x39a   : > { %v3542_v45 = vpop.f32.mrf.mxu1  ;;  %3544 = vmatpush3.msk.msra.mxu0 %vm840_vm3, %v836_v43  ;;  %v3528_v46 = vpop.f32.mrf.mxu0 }
 0x39b   : > { %3546 = vmatmul.mubr.msk.f32.vlgmr.msra.gmra.mxu0 %vm605_vm2, %v4021_v41  ;;  %3551 = vmatprep.subr.mxu0 %v3823_v1  ;;  %v989_v50 = vmul.f32 0.1, %v3528_v46 }
 0x39c   : > { %3548 = vmatprep.mubr.msk.f32.mxu0 %vm605_vm2, %v4023_v42  ;;  %v729_v48 = vpop.f32.mrf.mxu0 }
 0x39d   : > { %v988_v53 = vmul.f32 0.1, %v729_v48  ;;  %v4040_v56 = vsub.f32 %v3952_v8, %v989_v50 }
 0x39e   : > { %v3531_v49 = vpop.f32.mrf.mxu0 }
 0x39f   : > { %3549 = vmatmul.mubr.msk.f32.gmra.mxu0 %vm605_vm2, %v4028_v47  ;;  %v991_v51 = vmul.f32 0.1, %v3531_v49  ;;  %v4048_v58 = vsub.f32 %v3959_v9, %v988_v53 }
 0x3a0   : > { %v739_v52 = vpop.f32.mrf.mxu0  ;;  %3559 = vmatprep.mubr.msk.f32.mxu0 %vm3824_vm0, %v3823_v1 }
 0x3a1   : > { %v4037_v54 = vsub.f32 %v3905_v3, %v991_v51  ;;  %v990_v55 = vmul.f32 0.1, %v739_v52 }
 0x3a3   : > { %v4043_v57 = vsub.f32 %v3945_v7, %v990_v55  ;;  %3563 = vmatpush3.msra.mxu1 %v4037_v54 }
 0x3a4   : > { %3564 = vmatprep.subr.mxu1 %v3823_v1 }
 0x3a5   : > { %3565 = vmatpush3.msra.mxu1 %v4043_v57 }
 0x3a6   : > { %3566 = vmatprep.subr.mxu1 %v3823_v1 }
 0x3a7   : > { %3567 = vmatpush3.msra.mxu1 %v4040_v56 }
 0x3a8   : > { %3568 = vmatprep.subr.mxu1 %v3823_v1 }
 0x3a9   : > { %3569 = vmatpush3.msra.mxu1 %v4048_v58 }
 0x45b   : > { %v3547_v59 = vpop.f32.mrf.mxu0 }
 0x45c   : > { %v979_v3 = vmul.f32 0.1, %v3547_v59 }
 0x45d   : > { %v952_v60 = vpop.f32.mrf.mxu0 }
 0x45e   : > { %v978_v9 = vmul.f32 0.1, %v952_v60  ;;  %v4064_v14 = vsub.f32 %v3915_v4, %v979_v3 }
 0x45f   : > { %v3550_v61 = vpop.f32.mrf.mxu0 }
 0x460   : > { %v981_v62 = vmul.f32 0.1, %v3550_v61  ;;  %v4069_v15 = vsub.f32 %v3927_v5, %v978_v9 }
 0x461   : > { %v962_v63 = vpop.f32.mrf.mxu0 }
 0x462   : > { %v4056_v7 = vsub.f32 %v3892_v0, %v981_v62  ;;  %v980_v8 = vmul.f32 0.1, %v962_v63  ;;  %v971_v0 = vsel %vm451_vm1, %v841_v44, 0.0 }
 0x464   : > { %v4059_v11 = vsub.f32 %v3898_v2, %v980_v8  ;;  %3552 = vmatpush3.msra.mxu0 %v4056_v7  ;;  %v972_v2 = vrot.slane %v971_v0, 4 }
 0x465   : > { %3553 = vmatprep.subr.mxu0 %v3823_v1 }
 0x466   : > { %3554 = vmatpush3.msra.mxu0 %v4059_v11  ;;  %v973_v4 = vadd.f32 %v972_v2, %v971_v0 }
 0x467   : > { %3555 = vmatprep.subr.mxu0 %v3823_v1 }
 0x468   : > { %3556 = vmatpush3.msra.mxu0 %v4064_v14  ;;  %v974_v16 = vrot.slane %v973_v4, 2 }
 0x469   : > { %3557 = vmatprep.subr.mxu0 %v3823_v1 }
 0x46a   : > { %3558 = vmatpush3.msra.mxu0 %v4069_v15  ;;  %v975_v17 = vadd.f32 %v974_v16, %v973_v4 }
 0x46b   : > { %3560 = vmatmul.mubr.msk.f32.vlgmr.msra.gmra.mxu0 %vm451_vm1, %v3936_v6 }
 0x46c   : > { %v976_v18 = vrot.slane %v975_v17, 1 }
 0x46e   : > { %v977_v20 = vadd.f32 %v976_v18, %v975_v17 }
 0x470   : > { %v986_v21 = vmul.f32 0.1, %v977_v20 }
 0x472   : > { %v4078_v5 = vsub.f32 %v3969_v13, %v986_v21  ;;  %v750_v13 = vadd.f32 %v749_v28, %v748_v27  ;;  %v4161_v28 = vld [vmem:[%s415_s27] sm:$0xff] }
 0x474   : > { %v1004_v22 = vrot.slane %v4078_v5, %v3964_v12  ;;  %v751_v29 = vrot.slane %v750_v13, 2 }
 0x476   : > { %v752_v30 = vadd.f32 %v751_v29, %v750_v13 }
 0x478   : > { %v753_v31 = vrot.slane %v752_v30, 1 }
 0x47a   : > { %v754_v32 = vadd.f32 %v753_v31, %v752_v30 }
 0x47c   : > { %v996_v33 = vmul.f32 0.1, %v754_v32 }
 0x47e   : > { %v4091_v35 = vsub.f32 %v3992_v19, %v996_v33 }
 0x480   : > { %v1081_v36 = vrot.slane %v4091_v35, %v3964_v12 }
 0x52b   : > { %v1072_v23 = vpop.f32.mrf.mxu0 }
 0x52c   : > { %v4082_v24 = vadd.f32 %v1072_v23, %v1004_v22 }
 0x52d   : > { %v3561_v25 = vpop.f32.mrf.mxu0 }
 0x52e   : > { %v1076_v26 = vmax.f32 %v4082_v24, 0.0  ;;  %vm1390_vm4 = vcmp.gt.f32.partialorder %v4082_v24, 0.0 }
 0x530   : > { %3571 = vmatmul.mubr.msk.f32.vlgmr.msra.gmra.mxu1 %vm451_vm1, %v1076_v26 }
 0x531   : > { %3594 = vmatprep.mubr.msk.f32.mxu1 %vm605_vm2, %v4016_v40 }
 0x5f0   : > { %v1152_v37 = vpop.f32.mrf.mxu1 }
 0x5f1   : > { %v1153_v39 = vadd.f32 %v1152_v37, %v1081_v36 }
 0x5f2   : > { %v3572_v43 = vpop.f32.mrf.mxu1 }
 0x5f3   : > { %v1156_v44 = vsel %vm605_vm2, %v1153_v39, -inf }
 0x5f4   : > { %1157 = vmax.xlane.f32.xlu0 %v1156_v44 }
 0x67d   : > { %v1158_v38 = vpop.xlane.xlu0 %1157 }
 0x67e   : > { %v1159_v45 = vsub.f32 %v1153_v39, %v1158_v38 }
 0x680   : > { %v1160_v46 = vmul.f32 1.442695, %v1159_v45 }
 0x682   : > { %3791 = vpow2.f32 %v1160_v46 }
 0x68f   : > { %v3792_v48 = vpop.eup %3791 }
 0x690   : > { %v1162_v49 = vsel %vm605_vm2, %v3792_v48, 0.0 }
 0x691   : > { %1163 = vadd.xlane.f32.xlu0 %v1162_v49 }
 0x6be   : > { %1169 = vxpose.xlu0.b32.start.end [1/1] (short) (narrow) %v1076_v26, 32 }
 0x71a   : > { %v1164_v19 = vpop.xlane.xlu0 %1163 }
 0x71b   : > { %3793 = vrcp.f32 %v1164_v19 }
 0x728   : > { %v3794_v50 = vpop.eup %3793 }
 0x729   : > { %v1166_v51 = vmul.f32 %v3794_v50, %v3792_v48 }
 0x72b   : > { %v1167_v52 = vsub.f32 %v1166_v51, %v4003_v34 }
 0x72d   : > { %v4098_v53 = vmul.f32 0.125, %v1167_v52 }
 0x72f   : > { %3573 = vmatprep.subr.mxu0 %v4098_v53  ;;  %v1298_v50 = vsel %vm605_vm2, %v4098_v53, 0.0 }
 0x730   : > { %3574 = vmatpush3.msra.mxu0 %v4098_v53  ;;  %v1299_v51 = vrot.slane %v1298_v50, 4 }
 0x731   : > { %3581 = vmatprep.subr.mxu0 %v3823_v1 }
 0x732   : > { %v1300_v52 = vadd.f32 %v1299_v51, %v1298_v50 }
 0x73a   : > { %v1185_v55 = vpop.trf.xlu0 }
 0x73b   : > { %3575 = vmatprep.mubr.msk.f32.mxu0 %vm605_vm2, %v1185_v55  ;;  %v1301_v55 = vrot.slane %v1300_v52, 2 }
 0x73e   : > { %v1186_v59 = vpop.trf.xlu0 }
 0x73f   : > { %3576 = vmatmul.mubr.msk.f32.vlgmr.msra.gmra.mxu0 %vm605_vm2, %v1186_v59  ;;  %v1302_v59 = vadd.f32 %v1301_v55, %v1300_v52 }
 0x740   : > { %3582 = vmatpush3.xpose.msk.msra.mxu0 %vm605_vm2, %v4037_v54 }
 0x741   : > { %3583 = vmatprep.subr.mxu0 %v3823_v1 }
 0x742   : > { %v1187_v60 = vpop.trf.xlu0 }
 0x743   : > { %3578 = vmatprep.mubr.msk.f32.mxu0 %vm605_vm2, %v1187_v60  ;;  %v1303_v60 = vrot.slane %v1302_v59, 1 }
 0x744   : > { %3584 = vmatpush3.xpose.msk.msra.mxu0 %vm605_vm2, %v4043_v57 }
 0x745   : > { %3585 = vmatprep.subr.mxu0 %v3823_v1 }
 0x746   : > { %v1188_v61 = vpop.trf.xlu0 }
 0x747   : > { %3579 = vmatmul.mubr.msk.f32.gmra.mxu0 %vm605_vm2, %v1188_v61  ;;  %v1304_v61 = vadd.f32 %v1303_v60, %v1302_v59 }
 0x748   : > { %3586 = vmatpush3.xpose.msk.msra.mxu0 %vm605_vm2, %v4040_v56  ;;  %3589 = vmatprep.mubr.msk.f32.mxu0 %vm3824_vm0, %v3823_v1 }
 0x749   : > { %3587 = vmatprep.subr.mxu0 %v3823_v1 }
 0x74c   : > { %3588 = vmatpush3.xpose.msk.msra.mxu0 %vm605_vm2, %v4048_v58 }
 0x74d   : > { %3622 = vmatprep.subr.mxu0 %v3823_v1 }
 0x74f   : > { %3590 = vmatmul.mubr.msk.f32.vlgmr.msra.gmra.mxu0 %vm605_vm2, %v4098_v53 }
 0x750   : > { %3630 = vmatprep.mubr.msk.f32.mxu0 %vm3824_vm0, %v3823_v1 }
 0x7ff   : > { %v3577_v62 = vpop.f32.mrf.mxu0 }
 0x801   : > { %v1279_v63 = vpop.f32.mrf.mxu0 }
 0x807   : > { %v3580_v3 = vpop.f32.mrf.mxu0 }
 0x808   : > { %v1497_v26 = vmul.f32 0.1, %v3580_v3 }
 0x809   : > { %v1289_v8 = vpop.f32.mrf.mxu0 }
 0x80a   : > { %v4166_v13 = vsub.f32 %v4037_v54, %v1497_v26 }
 0x80f   : > { %v1386_v9 = vpop.f32.mrf.mxu0 }
 0x810   : > { %v1391_v0 = vsel %vm1390_vm4, %v1386_v9, 0.0  ;;  %3592 = vmatprep.subr.msk.mxu1 %vm1390_vm4, %v1386_v9 }
 0x811   : > { %v3591_v2 = vpop.f32.mrf.mxu0  ;;  %3593 = vmatpush3.msk.msra.mxu1 %vm1390_vm4, %v1386_v9  ;;  %v1477_v30 = vsel %vm451_vm1, %v1391_v0, 0.0  ;;  %vm3167_vm4 = vcmask 16384  }
 0x812   : > { %3595 = vmatmul.mubr.msk.f32.vlgmr.msra.gmra.mxu1 %vm605_vm2, %v4021_v41  ;;  %3600 = vmatprep.subr.mxu1 %v3823_v1  ;;  %v1478_v31 = vrot.slane %v1477_v30, 4 }
 0x813   : > { %3597 = vmatprep.mubr.msk.f32.mxu1 %vm605_vm2, %v4023_v42 }
 0x816   : > { %3598 = vmatmul.mubr.msk.f32.gmra.mxu1 %vm605_vm2, %v4028_v47 }
 0x817   : > { %3608 = vmatprep.mubr.msk.f32.mxu1 %vm3824_vm0, %v3823_v1 }
 0x8d2   : > { %v3596_v4 = vpop.f32.mrf.mxu1 }
 0x8d3   : > { %v1485_v21 = vmul.f32 0.1, %v3596_v4 }
 0x8d4   : > { %v1458_v16 = vpop.f32.mrf.mxu1 }
 0x8d5   : > { %v1484_v24 = vmul.f32 0.1, %v1458_v16 }
 0x8d6   : > { %v3599_v17 = vpop.f32.mrf.mxu1 }
 0x8d7   : > { %v1487_v18 = vmul.f32 0.1, %v3599_v17  ;;  %v4157_v27 = vsub.f32 %v4069_v15, %v1484_v24  ;;  %v1494_v15 = vmul.f32 0.1, %v1279_v63 }
 0x8d8   : > { %v1468_v20 = vpop.f32.mrf.mxu1 }
 0x8d9   : > { %v4136_v22 = vsub.f32 %v4056_v7, %v1487_v18  ;;  %v1486_v23 = vmul.f32 0.1, %v1468_v20  ;;  %v4150_v7 = vsub.f32 %v4064_v14, %v1485_v21  ;;  %v1495_v14 = vmul.f32 0.1, %v3577_v62 }
 0x8da   : > { %v1502_v62 = vmul.f32 0.1, %v1304_v61 }
 0x8db   : > { %v4139_v25 = vsub.f32 %v4059_v11, %v1486_v23  ;;  %3601 = vmatpush3.msra.mxu1 %v4136_v22  ;;  %3623 = vmatpush3.msra.mxu0 %v4136_v22  ;;  %v1496_v11 = vmul.f32 0.1, %v1289_v8  ;;  %v4183_v54 = vsub.f32 %v4040_v56, %v1495_v14  ;;  %v1479_v56 = vadd.f32 %v1478_v31, %v1477_v30 }
 0x8dc   : > { %3602 = vmatprep.subr.mxu1 %v3823_v1  ;;  %3624 = vmatprep.subr.mxu0 %v3823_v1  ;;  %v4219_v63 = vsub.f32 %v4091_v35, %v1502_v62 }
 0x8dd   : > { %3603 = vmatpush3.msra.mxu1 %v4139_v25  ;;  %3625 = vmatpush3.msra.mxu0 %v4139_v25  ;;  %v4174_v29 = vsub.f32 %v4043_v57, %v1496_v11  ;;  %v4188_v57 = vsub.f32 %v4048_v58, %v1494_v15  ;;  %v1480_v32 = vrot.slane %v1479_v56, 2 }
 0x8de   : > { %3604 = vmatprep.subr.mxu1 %v3823_v1  ;;  %3626 = vmatprep.subr.mxu0 %v3823_v1  ;;  %v1588_v3 = vrot.slane %v4219_v63, %v3964_v12 }
 0x8df   : > { %3605 = vmatpush3.msra.mxu1 %v4150_v7  ;;  %3627 = vmatpush3.msra.mxu0 %v4150_v7  ;;  %v1481_v33 = vadd.f32 %v1480_v32, %v1479_v56 }
 0x8e0   : > { %3606 = vmatprep.subr.mxu1 %v3823_v1  ;;  %3628 = vmatprep.subr.mxu0 %v3823_v1 }
 0x8e1   : > { %3607 = vmatpush3.msra.mxu1 %v4157_v27  ;;  %3629 = vmatpush3.msra.mxu0 %v4157_v27  ;;  %v1482_v36 = vrot.slane %v1481_v33, 1 }
 0x8e2   : > { %3609 = vmatmul.mubr.msk.f32.vlgmr.msra.gmra.mxu1 %vm451_vm1, %v4161_v28  ;;  %3611 = vmatprep.subr.mxu1 %v3823_v1 }
 0x8e3   : > { %3631 = vmatmul.mubr.msk.f32.vlgmr.msra.gmra.mxu0 %vm451_vm1, %v3936_v6  ;;  %3612 = vmatpush3.msra.mxu1 %v4166_v13  ;;  %v1483_v37 = vadd.f32 %v1482_v36, %v1481_v33 }
 0x8e4   : > { %3613 = vmatprep.subr.mxu1 %v3823_v1  ;;  %3619 = vmatprep.mubr.msk.f32.mxu1 %vm3824_vm0, %v3823_v1 }
 0x8e5   : > { %3614 = vmatpush3.msra.mxu1 %v4174_v29  ;;  %v1492_v39 = vmul.f32 0.1, %v1483_v37 }
 0x8e6   : > { %3615 = vmatprep.subr.mxu1 %v3823_v1 }
 0x8e7   : > { %3616 = vmatpush3.msra.mxu1 %v4183_v54  ;;  %v4196_v58 = vsub.f32 %v4078_v5, %v1492_v39 }
 0x8e8   : > { %3617 = vmatprep.subr.mxu1 %v3823_v1 }
 0x8e9   : > { %3618 = vmatpush3.msra.mxu1 %v4188_v57  ;;  %v1508_v43 = vrot.slane %v4196_v58, %v3964_v12 }
 0x8ea   : > { %3633 = vmatprep.subr.mxu1 %v3823_v1 }
 0x9a2   : > { %v1579_v44 = vpop.f32.mrf.mxu1 }
 0x9a3   : > { %v1580_v38 = vadd.f32 %v1579_v44, %v1508_v43  ;;  %v1799_v45 = vpop.f32.mrf.mxu0 }
 0x9a4   : > { %v3610_v46 = vpop.f32.mrf.mxu1  ;;  %v4204_v19 = vadd.f32 %v1799_v45, %v1508_v43 }
 0x9a5   : > { %v1583_v48 = vmax.f32 %v1580_v38, 0.0  ;;  %v3632_v49 = vpop.f32.mrf.mxu0 }
 0x9a6   : > { %v1803_v5 = vmax.f32 %v4204_v19, 0.0  ;;  %vm2111_vm5 = vcmp.gt.f32.partialorder %v4204_v19, 0.0 }
 0x9a7   : > { %3620 = vmatmul.mubr.msk.f32.vlgmr.msra.gmra.mxu1 %vm451_vm1, %v1583_v48 }
 0x9a8   : > { %3634 = vmatpush3.msra.mxu1 %v4166_v13  ;;  %3641 = vmatprep.mubr.msk.f32.mxu1 %vm3824_vm0, %v3823_v1 }
 0x9a9   : > { %3635 = vmatprep.subr.mxu1 %v3823_v1 }
 0x9aa   : > { %3636 = vmatpush3.msra.mxu1 %v4174_v29 }
 0x9ab   : > { %3637 = vmatprep.subr.mxu1 %v3823_v1 }
 0x9ac   : > { %3638 = vmatpush3.msra.mxu1 %v4183_v54 }
 0x9ad   : > { %3639 = vmatprep.subr.mxu1 %v3823_v1 }
 0x9ae   : > { %3640 = vmatpush3.msra.mxu1 %v4188_v57 }
 0x9af   : > { %3642 = vmatmul.mubr.msk.f32.vlgmr.msra.gmra.mxu1 %vm451_vm1, %v1803_v5 }
 0x9b0   : > { %3665 = vmatprep.mubr.msk.f32.mxu1 %vm605_vm2, %v4016_v40 }
 0xa67   : > { %v1659_v8 = vpop.f32.mrf.mxu1 }
 0xa68   : > { %v4223_v9 = vadd.f32 %v1659_v8, %v1588_v3 }
 0xa69   : > { %v3621_v0 = vpop.f32.mrf.mxu1 }
 0xa6f   : > { %v1873_v2 = vpop.f32.mrf.mxu1 }
 0xa70   : > { %v1874_v4 = vadd.f32 %v1873_v2, %v1588_v3 }
 0xa71   : > { %v3643_v53 = vpop.f32.mrf.mxu1 }
 0xa72   : > { %v1877_v16 = vsel %vm605_vm2, %v1874_v4, -inf }
 0xa73   : > { %1878 = vmax.xlane.f32.xlu1 %v1877_v16 }
 0xaa6   : > { %1890 = vxpose.xlu1.b32.start.end [1/1] (short) (narrow) %v1803_v5, 32 }
 0xafc   : > { %v1879_v17 = vpop.xlane.xlu1 %1878 }
 0xafd   : > { %v1880_v18 = vsub.f32 %v1874_v4, %v1879_v17 }
 0xaff   : > { %v1881_v20 = vmul.f32 1.442695, %v1880_v18 }
 0xb01   : > { %3795 = vpow2.f32 %v1881_v20 }
 0xb0e   : > { %v3796_v35 = vpop.eup %3795 }
 0xb0f   : > { %v1883_v21 = vsel %vm605_vm2, %v3796_v35, 0.0 }
 0xb10   : > { %1884 = vadd.xlane.f32.xlu0 %v1883_v21 }
 0xb22   : > { %v1906_v23 = vpop.trf.xlu1 }
 0xb23   : > { %3646 = vmatprep.mubr.msk.f32.mxu0 %vm605_vm2, %v1906_v23 }
 0xb26   : > { %v1907_v26 = vpop.trf.xlu1 }
 0xb2a   : > { %v1908_v30 = vpop.trf.xlu1 }
 0xb2e   : > { %v1909_v56 = vpop.trf.xlu1 }
 0xb99   : > { %v1885_v24 = vpop.xlane.xlu0 %1884 }
 0xb9a   : > { %3797 = vrcp.f32 %v1885_v24 }
 0xba7   : > { %v3798_v11 = vpop.eup %3797 }
 0xba8   : > { %v1887_v14 = vmul.f32 %v3798_v11, %v3796_v35 }
 0xbaa   : > { %v1888_v15 = vsub.f32 %v1887_v14, %v4003_v34 }
 0xbac   : > { %v4229_v31 = vmul.f32 0.125, %v1888_v15 }
 0xbae   : > { %3644 = vmatprep.subr.mxu0 %v4229_v31  ;;  %v2019_v24 = vsel %vm605_vm2, %v4229_v31, 0.0 }
 0xbaf   : > { %3645 = vmatpush3.msra.mxu0 %v4229_v31 }
 0xbb0   : > { %3647 = vmatmul.mubr.msk.f32.vlgmr.msra.gmra.mxu0 %vm605_vm2, %v1907_v26  ;;  %3652 = vmatprep.subr.mxu0 %v3823_v1  ;;  %v2020_v26 = vrot.slane %v2019_v24, 4 }
 0xbb1   : > { %3653 = vmatpush3.xpose.msk.msra.mxu0 %vm605_vm2, %v4166_v13  ;;  %3649 = vmatprep.mubr.msk.f32.mxu0 %vm605_vm2, %v1908_v30 }
 0xbb2   : > { %3654 = vmatprep.subr.mxu0 %v3823_v1  ;;  %v2021_v11 = vadd.f32 %v2020_v26, %v2019_v24 }
 0xbb4   : > { %3650 = vmatmul.mubr.msk.f32.gmra.mxu0 %vm605_vm2, %v1909_v56  ;;  %v2022_v14 = vrot.slane %v2021_v11, 2 }
 0xbb5   : > { %3655 = vmatpush3.xpose.msk.msra.mxu0 %vm605_vm2, %v4174_v29  ;;  %3660 = vmatprep.mubr.msk.f32.mxu0 %vm3824_vm0, %v3823_v1 }
 0xbb6   : > { %3656 = vmatprep.subr.mxu0 %v3823_v1  ;;  %v2023_v15 = vadd.f32 %v2022_v14, %v2021_v11 }
 0xbb8   : > { %v2024_v30 = vrot.slane %v2023_v15, 1 }
 0xbb9   : > { %3657 = vmatpush3.xpose.msk.msra.mxu0 %vm605_vm2, %v4183_v54 }
 0xbba   : > { %3658 = vmatprep.subr.mxu0 %v3823_v1  ;;  %v2025_v56 = vadd.f32 %v2024_v30, %v2023_v15 }
 0xbbd   : > { %3659 = vmatpush3.xpose.msk.msra.mxu0 %vm605_vm2, %v4188_v57 }
 0xbbe   : > { %3693 = vmatprep.subr.mxu0 %v3823_v1 }
 0xbc0   : > { %3661 = vmatmul.mubr.msk.f32.vlgmr.msra.gmra.mxu0 %vm605_vm2, %v4229_v31 }
 0xbc1   : > { %3701 = vmatprep.mubr.msk.f32.mxu0 %vm3824_vm0, %v3823_v1 }
 0xc70   : > { %v3648_v32 = vpop.f32.mrf.mxu0 }
 0xc72   : > { %v2000_v33 = vpop.f32.mrf.mxu0 }
 0xc74   : > { %v3651_v36 = vpop.f32.mrf.mxu0 }
 0xc75   : > { %v2218_v55 = vmul.f32 0.1, %v3651_v36 }
 0xc76   : > { %v2010_v37 = vpop.f32.mrf.mxu0 }
 0xc77   : > { %v4290_v60 = vsub.f32 %v4166_v13, %v2218_v55 }
 0xc80   : > { %v2107_v39 = vpop.f32.mrf.mxu0 }
 0xc81   : > { %v2112_v43 = vsel %vm2111_vm5, %v2107_v39, 0.0  ;;  %3663 = vmatprep.subr.msk.mxu1 %vm2111_vm5, %v2107_v39 }
 0xc82   : > { %v3662_v44 = vpop.f32.mrf.mxu0  ;;  %3664 = vmatpush3.msk.msra.mxu1 %vm2111_vm5, %v2107_v39 }
 0xc83   : > { %3666 = vmatmul.mubr.msk.f32.vlgmr.msra.gmra.mxu1 %vm605_vm2, %v4021_v41  ;;  %3671 = vmatprep.subr.mxu1 %v3823_v1 }
 0xc84   : > { %3668 = vmatprep.mubr.msk.f32.mxu1 %vm605_vm2, %v4023_v42 }
 0xc87   : > { %3669 = vmatmul.mubr.msk.f32.gmra.mxu1 %vm605_vm2, %v4028_v47 }
 0xc88   : > { %3679 = vmatprep.mubr.msk.f32.mxu1 %vm3824_vm0, %v3823_v1 }
 0xd43   : > { %v3667_v38 = vpop.f32.mrf.mxu1 }
 0xd44   : > { %v2206_v19 = vmul.f32 0.1, %v3667_v38 }
 0xd45   : > { %v2179_v45 = vpop.f32.mrf.mxu1 }
 0xd46   : > { %v2205_v51 = vmul.f32 0.1, %v2179_v45  ;;  %v4276_v59 = vsub.f32 %v4150_v7, %v2206_v19  ;;  %v2216_v7 = vmul.f32 0.1, %v3648_v32  ;;  %v2223_v32 = vmul.f32 0.1, %v2025_v56 }
 0xd47   : > { %v3670_v46 = vpop.f32.mrf.mxu1  ;;  %v1663_v45 = vsel %vm605_vm2, %v4223_v9, -inf }
 0xd48   : > { %v2208_v48 = vmul.f32 0.1, %v3670_v46  ;;  %v4307_v13 = vsub.f32 %v4183_v54, %v2216_v7 }
 0xd49   : > { %v2189_v49 = vpop.f32.mrf.mxu1 }
 0xd4a   : > { %v4266_v5 = vsub.f32 %v4136_v22, %v2208_v48  ;;  %v2207_v50 = vmul.f32 0.1, %v2189_v49  ;;  %v2217_v22 = vmul.f32 0.1, %v2010_v37 }
 0xd4c   : > { %v4269_v52 = vsub.f32 %v4139_v25, %v2207_v50  ;;  %3672 = vmatpush3.msra.mxu1 %v4266_v5  ;;  %3694 = vmatpush3.msra.mxu0 %v4266_v5  ;;  %v4283_v25 = vsub.f32 %v4157_v27, %v2205_v51  ;;  %v2215_v27 = vmul.f32 0.1, %v2000_v33  ;;  %v4298_v61 = vsub.f32 %v4174_v29, %v2217_v22 }
 0xd4d   : > { %3673 = vmatprep.subr.mxu1 %v3823_v1  ;;  %3695 = vmatprep.subr.mxu0 %v3823_v1  ;;  %v4343_v33 = vsub.f32 %v4219_v63, %v2223_v32 }
 0xd4e   : > { %3674 = vmatpush3.msra.mxu1 %v4269_v52  ;;  %3696 = vmatpush3.msra.mxu0 %v4269_v52  ;;  %v4312_v29 = vsub.f32 %v4188_v57, %v2215_v27 }
 0xd4f   : > { %3675 = vmatprep.subr.mxu1 %v3823_v1  ;;  %3697 = vmatprep.subr.mxu0 %v3823_v1  ;;  %v2306_v36 = vrot.slane %v4343_v33, %v3964_v12 }
 0xd50   : > { %3676 = vmatpush3.msra.mxu1 %v4276_v59  ;;  %3698 = vmatpush3.msra.mxu0 %v4276_v59 }
 0xd51   : > { %3677 = vmatprep.subr.mxu1 %v3823_v1  ;;  %3699 = vmatprep.subr.mxu0 %v3823_v1 }
 0xd52   : > { %3678 = vmatpush3.msra.mxu1 %v4283_v25  ;;  %3700 = vmatpush3.msra.mxu0 %v4283_v25 }
 0xd53   : > { %3680 = vmatmul.mubr.msk.f32.vlgmr.msra.gmra.mxu1 %vm451_vm1, %v4161_v28  ;;  %3682 = vmatprep.subr.mxu1 %v3823_v1 }
 0xd54   : > { %3702 = vmatmul.mubr.msk.f32.vlgmr.msra.gmra.mxu0 %vm451_vm1, %v3936_v6  ;;  %3683 = vmatpush3.msra.mxu1 %v4290_v60  ;;  %v2198_v6 = vsel %vm451_vm1, %v2112_v43, 0.0 }
 0xd55   : > { %3684 = vmatprep.subr.mxu1 %v3823_v1  ;;  %3690 = vmatprep.mubr.msk.f32.mxu1 %vm3824_vm0, %v3823_v1  ;;  %v2199_v62 = vrot.slane %v2198_v6, 4 }
 0xd56   : > { %3685 = vmatpush3.msra.mxu1 %v4298_v61 }
 0xd57   : > { %3686 = vmatprep.subr.mxu1 %v3823_v1  ;;  %v2200_v54 = vadd.f32 %v2199_v62, %v2198_v6 }
 0xd58   : > { %3687 = vmatpush3.msra.mxu1 %v4307_v13 }
 0xd59   : > { %3688 = vmatprep.subr.mxu1 %v3823_v1  ;;  %v2201_v3 = vrot.slane %v2200_v54, 2 }
 0xd5a   : > { %3689 = vmatpush3.msra.mxu1 %v4312_v29 }
 0xd5b   : > { %3704 = vmatprep.subr.mxu1 %v3823_v1  ;;  %v2202_v8 = vadd.f32 %v2201_v3, %v2200_v54 }
 0xd5d   : > { %v2203_v0 = vrot.slane %v2202_v8, 1 }
 0xd5f   : > { %v2204_v2 = vadd.f32 %v2203_v0, %v2202_v8 }
 0xd61   : > { %v2213_v4 = vmul.f32 0.1, %v2204_v2 }
 0xd63   : > { %v4320_v57 = vsub.f32 %v4196_v58, %v2213_v4 }
 0xd65   : > { %v2229_v53 = vrot.slane %v4320_v57, %v3964_v12 }
 0xe13   : > { %v2297_v16 = vpop.f32.mrf.mxu1 }
 0xe14   : > { %v2298_v17 = vadd.f32 %v2297_v16, %v2229_v53  ;;  %v2516_v18 = vpop.f32.mrf.mxu0 }
 0xe15   : > { %v3681_v20 = vpop.f32.mrf.mxu1  ;;  %v4328_v23 = vadd.f32 %v2516_v18, %v2229_v53 }
 0xe16   : > { %v2301_v35 = vmax.f32 %v2298_v17, 0.0  ;;  %v3703_v21 = vpop.f32.mrf.mxu0 }
 0xe17   : > { %v2520_v58 = vmax.f32 %v4328_v23, 0.0  ;;  %vm2828_vm6 = vcmp.gt.f32.partialorder %v4328_v23, 0.0 }
 0xe18   : > { %3691 = vmatmul.mubr.msk.f32.vlgmr.msra.gmra.mxu1 %vm451_vm1, %v2301_v35 }
 0xe19   : > { %3705 = vmatpush3.msra.mxu1 %v4290_v60  ;;  %3712 = vmatprep.mubr.msk.f32.mxu1 %vm3824_vm0, %v3823_v1 }
 0xe1a   : > { %3706 = vmatprep.subr.mxu1 %v3823_v1 }
 0xe1b   : > { %3707 = vmatpush3.msra.mxu1 %v4298_v61 }
 0xe1c   : > { %3708 = vmatprep.subr.mxu1 %v3823_v1 }
 0xe1d   : > { %3709 = vmatpush3.msra.mxu1 %v4307_v13 }
 0xe1e   : > { %3710 = vmatprep.subr.mxu1 %v3823_v1 }
 0xe1f   : > { %3711 = vmatpush3.msra.mxu1 %v4312_v29 }
 0xe20   : > { %3713 = vmatmul.mubr.msk.f32.vlgmr.msra.gmra.mxu1 %vm451_vm1, %v2520_v58 }
 0xe21   : > { %3736 = vmatprep.mubr.msk.f32.mxu1 %vm605_vm2, %v4016_v40 }
 0xed8   : > { %v2377_v37 = vpop.f32.mrf.mxu1 }
 0xed9   : > { %v4347_v39 = vadd.f32 %v2377_v37, %v2306_v36 }
 0xeda   : > { %v3692_v40 = vpop.f32.mrf.mxu1 }
 0xedb   : > { %v2381_v50 = vsel %vm605_vm2, %v4347_v39, -inf }
 0xee0   : > { %v2590_v43 = vpop.f32.mrf.mxu1 }
 0xee1   : > { %v2591_v44 = vadd.f32 %v2590_v43, %v2306_v36 }
 0xee2   : > { %v3714_v31 = vpop.f32.mrf.mxu1 }
 0xee3   : > { %v2594_v38 = vsel %vm605_vm2, %v2591_v44, -inf }
 0xee4   : > { %2595 = vmax.xlane.f32.xlu0 %v2594_v38 }
 0xf11   : > { %2607 = vxpose.xlu0.b32.start.end [1/1] (short) (narrow) %v2520_v58, 32 }
 0xf4a   : > { %1664 = vmax.xlane.f32.xlu0 %v1663_v45 }
 0xf6d   : > { %v2596_v63 = vpop.xlane.xlu0 %2595 }
 0xf6e   : > { %v2597_v46 = vsub.f32 %v2591_v44, %v2596_v63 }
 0xf70   : > { %v2598_v48 = vmul.f32 1.442695, %v2597_v46 }
 0xf72   : > { %3799 = vpow2.f32 %v2598_v48 }
 0xf7f   : > { %v3800_v49 = vpop.eup %3799 }
 0xf80   : > { %v2600_v19 = vsel %vm605_vm2, %v3800_v49, 0.0 }
 0xf81   : > { %2601 = vadd.xlane.f32.xlu1 %v2600_v19 }
 0xf85   : > { %2382 = vmax.xlane.f32.xlu1 %v2381_v50 }
 0xf8d   : > { %v2623_v51 = vpop.trf.xlu0 }
 0xf8e   : > { %3717 = vmatprep.mubr.msk.f32.mxu0 %vm605_vm2, %v2623_v51 }
 0xf91   : > { %v2624_v7 = vpop.trf.xlu0 }
 0xf95   : > { %v2625_v54 = vpop.trf.xlu0 }
 0xf99   : > { %v2626_v3 = vpop.trf.xlu0 }
 0xfd3   : > { %v1665_v50 = vpop.xlane.xlu0 %1664 }
 0xfd4   : > { %vm1688_vm7 = vcmp.eq.f32.partialorder %v4223_v9, %v1665_v50 }
0x100a   : > { %v2602_v55 = vpop.xlane.xlu1 %2601 }
0x100b   : > { %3801 = vrcp.f32 %v2602_v55 }
0x100e   : > { %v2383_v55 = vpop.xlane.xlu1 %2382 }
0x100f   : > { %vm2406_vm8 = vcmp.eq.f32.partialorder %v4347_v39, %v2383_v55 }
0x1018   : > { %v3802_v22 = vpop.eup %3801 }
0x1019   : > { %v2604_v27 = vmul.f32 %v3802_v22, %v3800_v49 }
0x101b   : > { %v2605_v6 = vsub.f32 %v2604_v27, %v4003_v34 }
0x101d   : > { %v4357_v62 = vmul.f32 0.125, %v2605_v6 }
0x101f   : > { %3715 = vmatprep.subr.mxu0 %v4357_v62 }
0x1020   : > { %3716 = vmatpush3.msra.mxu0 %v4357_v62 }
0x1021   : > { %3718 = vmatmul.mubr.msk.f32.vlgmr.msra.gmra.mxu0 %vm605_vm2, %v2624_v7  ;;  %3723 = vmatprep.subr.mxu0 %v3823_v1 }
0x1022   : > { %3724 = vmatpush3.xpose.msk.msra.mxu0 %vm605_vm2, %v4290_v60  ;;  %3720 = vmatprep.mubr.msk.f32.mxu0 %vm605_vm2, %v2625_v54 }
0x1023   : > { %3725 = vmatprep.subr.mxu0 %v3823_v1 }
0x1025   : > { %3721 = vmatmul.mubr.msk.f32.gmra.mxu0 %vm605_vm2, %v2626_v3 }
0x1026   : > { %3726 = vmatpush3.xpose.msk.msra.mxu0 %vm605_vm2, %v4298_v61  ;;  %3731 = vmatprep.mubr.msk.f32.mxu0 %vm3824_vm0, %v3823_v1 }
0x1027   : > { %3727 = vmatprep.subr.mxu0 %v3823_v1 }
0x102a   : > { %3728 = vmatpush3.xpose.msk.msra.mxu0 %vm605_vm2, %v4307_v13 }
0x102b   : > { %3729 = vmatprep.subr.mxu0 %v3823_v1 }
0x102e   : > { %3730 = vmatpush3.xpose.msk.msra.mxu0 %vm605_vm2, %v4312_v29 }
0x1031   : > { %3732 = vmatmul.mubr.msk.f32.vlgmr.msra.gmra.mxu0 %vm605_vm2, %v4357_v62 }
0x10e1   : > { %v3719_v34 = vpop.f32.mrf.mxu0 }
0x10e3   : > { %v2717_v8 = vpop.f32.mrf.mxu0 }
0x10e5   : > { %v3722_v0 = vpop.f32.mrf.mxu0 }
0x10e7   : > { %v2727_v2 = vpop.f32.mrf.mxu0 }
0x10e8   : > { %v2934_v11 = vmul.f32 0.1, %v2727_v2 }
0x10f1   : > { %v2824_v4 = vpop.f32.mrf.mxu0 }
0x10f2   : > { %v2829_v53 = vsel %vm2828_vm6, %v2824_v4, 0.0  ;;  %3734 = vmatprep.subr.msk.mxu1 %vm2828_vm6, %v2824_v4 }
0x10f3   : > { %v3733_v16 = vpop.f32.mrf.mxu0  ;;  %3735 = vmatpush3.msk.msra.mxu1 %vm2828_vm6, %v2824_v4 }
0x10f4   : > { %3737 = vmatmul.mubr.msk.f32.vlgmr.msra.gmra.mxu1 %vm605_vm2, %v4021_v41  ;;  %3742 = vmatprep.subr.mxu1 %v3823_v1  ;;  %v4432_v16 = vsub.f32 %v4347_v39, %v2383_v55 }
0x10f5   : > { %3739 = vmatprep.mubr.msk.f32.mxu1 %vm605_vm2, %v4023_v42  ;;  %v2935_v42 = vmul.f32 0.1, %v3722_v0 }
0x10f7   : > { %v2939_v15 = vsub.f32 %v4290_v60, %v2935_v42 }
0x10f8   : > { %3740 = vmatmul.mubr.msk.f32.gmra.mxu1 %vm605_vm2, %v4028_v47 }
0x10f9   : > { %3750 = vmatprep.mubr.msk.f32.mxu1 %vm3824_vm0, %v3823_v1 }
0x11b4   : > { %v3738_v17 = vpop.f32.mrf.mxu1 }
0x11b5   : > { %v2923_v23 = vmul.f32 0.1, %v3738_v17  ;;  %v2385_v17 = vmul.f32 1.442695, %v4432_v16 }
0x11b6   : > { %v2896_v18 = vpop.f32.mrf.mxu1 }
0x11b7   : > { %v2922_v24 = vmul.f32 0.1, %v2896_v18  ;;  %v2927_v47 = vsub.f32 %v4276_v59, %v2923_v23  ;;  %v2938_v59 = vsub.f32 %v4298_v61, %v2934_v11 }
0x11b8   : > { %v3741_v20 = vpop.f32.mrf.mxu1 }
0x11b9   : > { %v2925_v35 = vmul.f32 0.1, %v3741_v20  ;;  %v2926_v14 = vsub.f32 %v4283_v25, %v2922_v24 }
0x11ba   : > { %v2906_v21 = vpop.f32.mrf.mxu1 }
0x11bb   : > { %v2929_v58 = vsub.f32 %v4266_v5, %v2925_v35  ;;  %v2924_v41 = vmul.f32 0.1, %v2906_v21  ;;  %v2933_v5 = vmul.f32 0.1, %v3719_v34 }
0x11bd   : > { %v2928_v26 = vsub.f32 %v4269_v52, %v2924_v41  ;;  %3743 = vmatpush3.msra.mxu1 %v2929_v58  ;;  %v2932_v52 = vmul.f32 0.1, %v2717_v8  ;;  %v2937_v25 = vsub.f32 %v4307_v13, %v2933_v5 }
0x11be   : > { %3744 = vmatprep.subr.mxu1 %v3823_v1 }
0x11bf   : > { %3745 = vmatpush3.msra.mxu1 %v2928_v26  ;;  %v2936_v60 = vsub.f32 %v4312_v29, %v2932_v52 }
0x11c0   : > { %3746 = vmatprep.subr.mxu1 %v3823_v1 }
0x11c1   : > { %3747 = vmatpush3.msra.mxu1 %v2927_v47 }
0x11c2   : > { %3748 = vmatprep.subr.mxu1 %v3823_v1 }
0x11c3   : > { %3749 = vmatpush3.msra.mxu1 %v2926_v14 }
0x11c4   : > { %3751 = vmatmul.mubr.msk.f32.vlgmr.msra.gmra.mxu1 %vm451_vm1, %v4161_v28  ;;  %3753 = vmatprep.subr.mxu1 %v3823_v1  ;;  %v2915_v28 = vsel %vm451_vm1, %v2829_v53, 0.0 }
0x11c5   : > { %3754 = vmatpush3.msra.mxu1 %v2939_v15  ;;  %3761 = vmatprep.mubr.msk.f32.mxu1 %vm3824_vm0, %v3823_v1  ;;  %v2916_v61 = vrot.slane %v2915_v28, 4 }
0x11c6   : > { %3755 = vmatprep.subr.mxu1 %v3823_v1 }
0x11c7   : > { %3756 = vmatpush3.msra.mxu1 %v2938_v59  ;;  %v2917_v30 = vadd.f32 %v2916_v61, %v2915_v28 }
0x11c8   : > { %3757 = vmatprep.subr.mxu1 %v3823_v1 }
0x11c9   : > { %3758 = vmatpush3.msra.mxu1 %v2937_v25  ;;  %v2918_v56 = vrot.slane %v2917_v30, 2 }
0x11ca   : > { %3759 = vmatprep.subr.mxu1 %v3823_v1  ;;  %v2736_v1 = vsel %vm605_vm2, %v4357_v62, 0.0 }
0x11cb   : > { %3760 = vmatpush3.msra.mxu1 %v2936_v60  ;;  %v2919_v32 = vadd.f32 %v2918_v56, %v2917_v30  ;;  %v2737_v45 = vrot.slane %v2736_v1, 4 }
0x11cd   : > { %v2920_v36 = vrot.slane %v2919_v32, 1  ;;  %v2738_v63 = vadd.f32 %v2737_v45, %v2736_v1  ;;  %v3825_v1 = vmov 0  }
0x11cf   : > { %v2921_v37 = vadd.f32 %v2920_v36, %v2919_v32  ;;  %v2739_v46 = vrot.slane %v2738_v63, 2 }
0x11d1   : > { %v2930_v40 = vmul.f32 0.1, %v2921_v37  ;;  %v2740_v48 = vadd.f32 %v2739_v46, %v2738_v63 }
0x11d3   : > { %v2931_v13 = vsub.f32 %v4320_v57, %v2930_v40  ;;  %v2741_v49 = vrot.slane %v2740_v48, 1  ;;  %v4416_v57 = vand.u32 127, %v446_v10 }
0x11d5   : > { %v2946_v43 = vrot.slane %v2931_v13, %v3964_v12  ;;  %v2742_v19 = vadd.f32 %v2741_v49, %v2740_v48  ;;  %v1689_v7 = vsel %vm1688_vm7, %v4416_v57, 8  ;;  %v2407_v62 = vsel %vm2406_vm8, %v4416_v57, 8 }
0x11d6   : > { %v1690_v6 = vsel %vm605_vm2, %v1689_v7, 2147483647  ;;  %v2408_v0 = vsel %vm605_vm2, %v2407_v62, 2147483647  ;;  %vm3162_vm3 = vcmp.eq.s32.totalorder %v4416_v57, 2 }
0x11d7   : > { %v2940_v51 = vmul.f32 0.1, %v2742_v19  ;;  %v1692_v10 = vshra.s32 %v1690_v6, 16  ;;  %v2410_v2 = vshra.s32 %v2408_v0, 16  ;;  %v1691_v42 = vand.u32 65535, %v1690_v6 }
0x11d8   : > { %v2409_v52 = vand.u32 65535, %v2408_v0 }
0x11d9   : > { %v2941_v22 = vsub.f32 %v4343_v33, %v2940_v51  ;;  %v1694_v33 = vcvt.s32.f32 %v1692_v10  ;;  %v2412_v4 = vcvt.s32.f32 %v2410_v2  ;;  %v1693_v11 = vcvt.s32.f32 %v1691_v42 }
0x11da   : > { %v2411_v25 = vcvt.s32.f32 %v2409_v52 }
0x11db   : > { %v3023_v27 = vrot.slane %v2941_v22, %v3964_v12  ;;  %v4428_v12 = vsub.f32 %v4223_v9, %v1665_v50 }
0x11dd   : > { %v1667_v53 = vmul.f32 1.442695, %v4428_v12 }
0x11df   : > { %3803 = vpow2.f32 %v1667_v53 }
0x11e0   : > { %3805 = vpow2.f32 %v2385_v17 }
0x11ec   : > { %v3804_v41 = vpop.eup %3803 }
0x11ed   : > { %v1669_v39 = vsel %vm605_vm2, %v3804_v41, 0.0  ;;  %v3806_v24 = vpop.eup %3805 }
0x11ee   : > { %v2387_v47 = vsel %vm605_vm2, %v3806_v24, 0.0 }
0x1284   : > { %v3014_v44 = vpop.f32.mrf.mxu1 }
0x1285   : > { %v3015_v31 = vadd.f32 %v3014_v44, %v2946_v43  ;;  %v434_v44 = vld [vmem:[%s423_s30] sm:$0xff] }
0x1286   : > { %v3752_v29 = vpop.f32.mrf.mxu1 }
0x1287   : > { %v3018_v38 = vmax.f32 %v3015_v31, 0.0 }
0x1289   : > { %3762 = vmatmul.mubr.msk.f32.vlgmr.msra.gmra.mxu1 %vm451_vm1, %v3018_v38  ;;  %vm1728_vm1 = vcmp.eq.s32.totalorder %v4416_v57, 0 }
0x1349   : > { %v3094_v54 = vpop.f32.mrf.mxu1 }
0x134a   : > { %v3095_v3 = vadd.f32 %v3094_v54, %v3023_v27 }
0x134b   : > { %v3763_v34 = vpop.f32.mrf.mxu1 }
0x134c   : > { %v3098_v8 = vsel %vm605_vm2, %v3095_v3, -inf }
0x134d   : > { %3099 = vmax.xlane.f32.xlu1 %v3098_v8 }
0x1351   : > { %1695 = vmin.xlane.f32.xlu1 %v1694_v33 }
0x1355   : > { %2413 = vmin.xlane.f32.xlu1 %v2412_v4 }
0x13d6   : > { %v3100_v18 = vpop.xlane.xlu1 %3099 }
0x13d7   : > { %v4435_v20 = vsub.f32 %v3095_v3, %v3100_v18  ;;  %vm3123_vm9 = vcmp.eq.f32.partialorder %v3095_v3, %v3100_v18 }
0x13d8   : > { %v3124_v35 = vsel %vm3123_vm9, %v4416_v57, 8 }
0x13d9   : > { %v3102_v21 = vmul.f32 1.442695, %v4435_v20  ;;  %v3125_v9 = vsel %vm605_vm2, %v3124_v35, 2147483647 }
0x13da   : > { %v3127_v23 = vshra.s32 %v3125_v9, 16  ;;  %v1696_v26 = vpop.xlane.xlu1 %1695  ;;  %v3126_v28 = vand.u32 65535, %v3125_v9 }
0x13db   : > { %3807 = vpow2.f32 %v3102_v21  ;;  %vm1697_vm10 = vcmp.eq.f32.partialorder %v1694_v33, %v1696_v26  ;;  %v1702_v37 = vcvt.f32.s32 %v1696_v26 }
0x13dc   : > { %v3129_v58 = vcvt.s32.f32 %v3127_v23  ;;  %v1698_v14 = vsel %vm1697_vm10, %v1693_v11, inf  ;;  %v3128_v30 = vcvt.s32.f32 %v3126_v28 }
0x13dd   : > { %v1703_v13 = vshll.u32 %v1702_v37, 16 }
0x13de   : > { %3130 = vmin.xlane.f32.xlu1 %v3129_v58  ;;  %v2414_v15 = vpop.xlane.xlu1 %2413 }
0x13df   : > { %vm2415_vm11 = vcmp.eq.f32.partialorder %v2412_v4, %v2414_v15  ;;  %v2420_v38 = vcvt.f32.s32 %v2414_v15  ;;  %v433_v4 = vld [vmem:[%s419_s15] sm:$0xff]  ;;  %s426_s15 = scalar_lea.vmem %s4495_s9, %s4498_s14 }
0x13e0   : > { %v2416_v60 = vsel %vm2415_vm11, %v2411_v25, inf }
0x13e1   : > { %v2421_v49 = vshll.u32 %v2420_v38, 16 }
0x13e2   : > { %1670 = vadd.xlane.f32.xlu1 %v1669_v39 }
0x13e6   : > { %2388 = vadd.xlane.f32.xlu1 %v2387_v47 }
0x13e8   : > { %v3808_v5 = vpop.eup %3807 }
0x13e9   : > { %v3104_v59 = vsel %vm605_vm2, %v3808_v5, 0.0 }
0x13ea   : > { %1699 = vmin.xlane.f32.xlu1 %v1698_v14 }
0x13ee   : > { %3105 = vadd.xlane.f32.xlu1 %v3104_v59 }
0x13f2   : > { %2417 = vmin.xlane.f32.xlu1 %v2416_v60 }
0x1467   : > { %v4443_v61 = vpop.xlane.xlu1 %3130 }
0x1468   : > { %vm3132_vm12 = vcmp.eq.f32.partialorder %v3129_v58, %v4443_v61 }
0x1469   : > { %v3133_v56 = vsel %vm3132_vm12, %v3128_v30, inf }
0x146a   : > { %3134 = vmin.xlane.f32.xlu1 %v3133_v56 }
0x146b   : > { %v1671_v32 = vpop.xlane.xlu1 %1670 }
0x146c   : > { %3809 = vlog2.f32 %v1671_v32 }
0x146f   : > { %v2389_v36 = vpop.xlane.xlu1 %2388 }
0x1470   : > { %3811 = vlog2.f32 %v2389_v36 }
0x1473   : > { %v1700_v40 = vpop.xlane.xlu1 %1699 }
0x1474   : > { %v1701_v43 = vcvt.f32.s32 %v1700_v40 }
0x1476   : > { %v1704_v31 = vadd.s32 %v1703_v13, %v1701_v43 }
0x1477   : > { %v3106_v29 = vpop.xlane.xlu1 %3105 }
0x1478   : > { %vm1705_vm14 = vcmp.eq.s32.totalorder %v1704_v31, %v434_v44  ;;  %3813 = vlog2.f32 %v3106_v29 }
0x1479   : > { %v1706_v45 = vsel %vm1705_vm14, 1, %v3825_v1  ;;  %v3810_v55 = vpop.eup %3809 }
0x147a   : > { %v1708_v63 = vsel %vm1707_vm13, %v1706_v45, 0  ;;  %v1673_v7 = vmul.f32 0.6931472, %v3810_v55 }
0x147b   : > { %v2418_v46 = vpop.xlane.xlu1 %2417  ;;  %v1710_v48 = vshrl.u32 %v1708_v63, 16  ;;  %v1709_v8 = vand.u32 65535, %v1708_v63 }
0x147c   : > { %v2419_v19 = vcvt.f32.s32 %v2418_v46  ;;  %v1674_v2 = vsub.f32 %v4428_v12, %v1673_v7  ;;  %v3137_v12 = vcvt.f32.s32 %v4443_v61 }
0x147d   : > { %v1712_v50 = vcvt.s32.f32 %v1710_v48  ;;  %v3812_v6 = vpop.eup %3811  ;;  %v1711_v17 = vcvt.s32.f32 %v1709_v8 }
0x147e   : > { %v2422_v51 = vadd.s32 %v2421_v49, %v2419_v19  ;;  %v2391_v0 = vmul.f32 0.6931472, %v3812_v6  ;;  %v1675_v18 = vmul.f32 %v1674_v2, %v433_v4  ;;  %v3138_v39 = vshll.u32 %v3137_v12, 16 }
0x147f   : > { %1715 = vadd.xlane.f32.xlu1 %v1712_v50 }
0x1480   : > { %vm2423_vm15 = vcmp.eq.s32.totalorder %v2422_v51, %v434_v44  ;;  %v2392_v35 = vsub.f32 %v4432_v16, %v2391_v0  ;;  %v1676_v9 = vsel %vm605_vm2, %v1675_v18, 0.0 }
0x1481   : > { %v2424_v22 = vsel %vm2423_vm15, 1, %v3825_v1 }
0x1482   : > { %v2425_v27 = vsel %vm1707_vm13, %v2424_v22, 0  ;;  %v2393_v23 = vmul.f32 %v2392_v35, %v433_v4 }
0x1483   : > { %v2427_v62 = vshrl.u32 %v2425_v27, 16  ;;  %v2426_v54 = vand.u32 65535, %v2425_v27 }
0x1484   : > { %v2394_v58 = vsel %vm605_vm2, %v2393_v23, 0.0 }
0x1485   : > { %v3814_v3 = vpop.eup %3813  ;;  %v2429_v34 = vcvt.s32.f32 %v2427_v62  ;;  %v2428_v10 = vcvt.s32.f32 %v2426_v54 }
0x1486   : > { %v3108_v33 = vmul.f32 0.6931472, %v3814_v3 }
0x1487   : > { %2432 = vadd.xlane.f32.xlu1 %v2429_v34  ;;  %2430 = vadd.xlane.f32.xlu0 %v2428_v10 }
0x1488   : > { %v3109_v53 = vsub.f32 %v4435_v20, %v3108_v33 }
0x148a   : > { %v3110_v21 = vmul.f32 %v3109_v53, %v433_v4 }
0x148b   : > { %1713 = vadd.xlane.f32.xlu1 %v1711_v17 }
0x148c   : > { %v3111_v5 = vsel %vm605_vm2, %v3110_v21, 0.0  ;;  %vm2445_vm2 = vcmp.eq.s32.totalorder %v4416_v57, 1 }
0x148f   : > { %1677 = vadd.xlane.f32.xlu1 %v1676_v9 }
0x1493   : > { %2395 = vadd.xlane.f32.xlu1 %v2394_v58 }
0x14f3   : > { %v3135_v41 = vpop.xlane.xlu1 %3134 }
0x14f4   : > { %v3136_v24 = vcvt.f32.s32 %v3135_v41 }
0x14f6   : > { %v3139_v26 = vadd.s32 %v3138_v39, %v3136_v24 }
0x14f8   : > { %vm3140_vm0 = vcmp.eq.s32.totalorder %v3139_v26, %v434_v44 }
0x14f9   : > { %v3141_v20 = vsel %vm3140_vm0, 1, %v3825_v1 }
0x14fa   : > { %v3142_v42 = vsel %vm1707_vm13, %v3141_v20, 0 }
0x14fb   : > { %v3144_v16 = vshrl.u32 %v3142_v42, 16  ;;  %v3143_v47 = vand.u32 65535, %v3142_v42 }
0x14fd   : > { %v3146_v11 = vcvt.s32.f32 %v3144_v16  ;;  %v3145_v14 = vcvt.s32.f32 %v3143_v47 }
0x14ff   : > { %3149 = vadd.xlane.f32.xlu0 %v3146_v11  ;;  %3147 = vadd.xlane.f32.xlu1 %v3145_v14 }
0x1503   : > { %3112 = vadd.xlane.f32.xlu0 %v3111_v5 }
0x1508   : > { %v1716_v15 = vpop.xlane.xlu1 %1715 }
0x1509   : > { %v1718_v25 = vcvt.f32.s32 %v1716_v15 }
0x150b   : > { %v1719_v56 = vshll.u32 %v1718_v25, 16 }
0x1510   : > { %v2431_v52 = vpop.xlane.xlu0 %2430  ;;  %v2433_v59 = vpop.xlane.xlu1 %2432 }
0x1511   : > { %v2435_v60 = vcvt.f32.s32 %v2433_v59  ;;  %v2434_v28 = vcvt.f32.s32 %v2431_v52 }
0x1513   : > { %v2436_v61 = vshll.u32 %v2435_v60, 16 }
0x1514   : > { %v1714_v30 = vpop.xlane.xlu1 %1713 }
0x1515   : > { %v2437_v32 = vadd.s32 %v2436_v61, %v2434_v28  ;;  %v1717_v36 = vcvt.f32.s32 %v1714_v30 }
0x1517   : > { %v2438_v37 = vrot.slane %v2437_v32, 4  ;;  %v1720_v40 = vadd.s32 %v1719_v56, %v1717_v36 }
0x1518   : > { %v1678_v13 = vpop.xlane.xlu1 %1677 }
0x1519   : > { %v2439_v43 = vadd.s32 %v2438_v37, %v2437_v32  ;;  %v1721_v44 = vrot.slane %v1720_v40, 4  ;;  %v1679_v31 = vrot.slane %v1678_v13, 4 }
0x151b   : > { %v1722_v29 = vadd.s32 %v1721_v44, %v1720_v40  ;;  %v1680_v38 = vadd.f32 %v1679_v31, %v1678_v13  ;;  %v2440_v45 = vrot.slane %v2439_v43, 2 }
0x151c   : > { %v2396_v1 = vpop.xlane.xlu1 %2395 }
0x151d   : > { %v1681_v63 = vrot.slane %v1680_v38, 2  ;;  %v2397_v46 = vrot.slane %v2396_v1, 4  ;;  %v1723_v48 = vrot.slane %v1722_v29, 2  ;;  %v2441_v51 = vadd.s32 %v2440_v45, %v2439_v43 }
0x151f   : > { %v2398_v49 = vadd.f32 %v2397_v46, %v2396_v1  ;;  %v1682_v19 = vadd.f32 %v1681_v63, %v1680_v38  ;;  %v1724_v50 = vadd.s32 %v1723_v48, %v1722_v29  ;;  %v2442_v54 = vrot.slane %v2441_v51, 1 }
0x1521   : > { %v2399_v55 = vrot.slane %v2398_v49, 2  ;;  %v1683_v22 = vrot.slane %v1682_v19, 1  ;;  %v1725_v7 = vrot.slane %v1724_v50, 1  ;;  %v2443_v10 = vadd.s32 %v2442_v54, %v2441_v51 }
0x1523   : > { %v1684_v27 = vadd.f32 %v1683_v22, %v1682_v19  ;;  %v1726_v6 = vadd.s32 %v1725_v7, %v1724_v50  ;;  %v2400_v62 = vadd.f32 %v2399_v55, %v2398_v49 }
0x1525   : > { %3764 = vpush %v1684_v27  ;;  %v2401_v3 = vrot.slane %v2400_v62, 1 }
0x1526   : > { %3766 = vpush %v1726_v6 }
0x1527   : > { %v2402_v34 = vadd.f32 %v2401_v3, %v2400_v62 }
0x1529   : > { %3768 = vpush %v2402_v34 }
0x152a   : > { %3770 = vpush %v2443_v10 }
0x1556   : > { %s3765_s23 = spop %3764 }
0x1557   : > { %s3767_s16 = spop %3766  ;;  %s1686_s18 = ssub.f32 0.0, %s3765_s23 }
0x1558   : > { %v1731_v42 = vstv %s3767_s16 }
0x1559   : > { %s1687_s20 = smul.f32 0.125, %s1686_s18  ;;  %v1732_v11 = vsel %vm1728_vm1, %v1731_v42, 0 }
0x155a   : > { %s3769_s17 = spop %3768 }
0x155b   : > { %s2404_s19 = ssub.f32 0.0, %s3769_s17  ;;  %s3771_s21 = spop %3770  ;;  %v1729_v47 = vstv %s1687_s20 }
0x155c   : > { %v2448_v16 = vstv %s3771_s21  ;;  %v1730_v52 = vsel %vm1728_vm1, %v1729_v47, 0.0 }
0x155d   : > { %s2405_s22 = smul.f32 0.125, %s2404_s19  ;;  %v2449_v5 = vsel %vm2445_vm2, %v2448_v16, %v1732_v11 }
0x155f   : > { %v2446_v14 = vstv %s2405_s22 }
0x1560   : > { %v2447_v25 = vsel %vm2445_vm2, %v2446_v14, %v1730_v52 }
0x1588   : > { %v3150_v8 = vpop.xlane.xlu0 %3149  ;;  %v3148_v0 = vpop.xlane.xlu1 %3147 }
0x1589   : > { %v3152_v33 = vcvt.f32.s32 %v3150_v8  ;;  %v3151_v4 = vcvt.f32.s32 %v3148_v0 }
0x158b   : > { %v3153_v2 = vshll.u32 %v3152_v33, 16 }
0x158c   : > { %v3113_v53 = vpop.xlane.xlu0 %3112 }
0x158d   : > { %v3154_v17 = vadd.s32 %v3153_v2, %v3151_v4  ;;  %v3114_v18 = vrot.slane %v3113_v53, 4 }
0x158f   : > { %v3155_v35 = vrot.slane %v3154_v17, 4  ;;  %v3115_v21 = vadd.f32 %v3114_v18, %v3113_v53 }
0x1591   : > { %v3156_v9 = vadd.s32 %v3155_v35, %v3154_v17  ;;  %v3116_v23 = vrot.slane %v3115_v21, 2 }
0x1593   : > { %v3117_v58 = vadd.f32 %v3116_v23, %v3115_v21  ;;  %v3157_v12 = vrot.slane %v3156_v9, 2 }
0x1595   : > { %v3118_v41 = vrot.slane %v3117_v58, 1  ;;  %v3158_v39 = vadd.s32 %v3157_v12, %v3156_v9 }
0x1597   : > { %v3119_v24 = vadd.f32 %v3118_v41, %v3117_v58  ;;  %v3159_v26 = vrot.slane %v3158_v39, 1 }
0x1599   : > { %3772 = vpush %v3119_v24  ;;  %v3160_v20 = vadd.s32 %v3159_v26, %v3158_v39 }
0x159b   : > { %3774 = vpush %v3160_v20 }
0x15ca   : > { %s3773_s24 = spop %3772 }
0x15cb   : > { %s3121_s25 = ssub.f32 0.0, %s3773_s24 }
0x15cc   : > { %s3775_s29 = spop %3774 }
0x15cd   : > { %s3122_s30 = smul.f32 0.125, %s3121_s25  ;;  %v3165_v15 = vstv %s3775_s29 }
0x15ce   : > { %v3166_v59 = vsel %vm3162_vm3, %v3165_v15, %v2449_v5 }
0x15cf   : > { %v3163_v60 = vstv %s3122_s30  ;;  %3169 = vst.msk [vmem:[%s429_s28] sm:$0x1] %vm3167_vm4, %v3166_v59 }
0x15d0   : > { %v3164_v28 = vsel %vm3162_vm3, %v3163_v60, %v2447_v25 }
0x15d1   : > { %3168 = vst.msk [vmem:[%s426_s15] sm:$0x1] %vm3167_vm4, %v3164_v28 }
0x15d2 PF: > { %s21_s13 = sadd.s32 1, %s3821_s13  }
0x15d3   : > { %p18_p4 = scmp.ge.s32.totalorder %s21_s13, 4  }
0x15d5   :  { %20 = sbr.rel (!%p18_p4) target bundleno = 1 (0x1), region = 110 }

</bundles_post_ra>
